<compile_context>
chip_gen: v7x
topology: tpu7x:2x2x1
jax: 0.10.0
libtpu: 0.0.40
codegen_flags: <defaults>
</compile_context>

<pallas_src>
import jax
import jax.numpy as jnp
from jax.experimental import pallas as pl
from jax.experimental.pallas import tpu as pltpu


def _round_up(n, m):
    return (n + m - 1) // m * m


def _mlp_kernel(x_ref, w1_ref, b1_ref, w2_ref, b2_ref, w3_ref, b3_ref, o_ref):
    # In-kernel f32 -> bf16 cast of the streamed x tile (VPU work, hidden under fc1).
    x_bf = x_ref[...].astype(jnp.bfloat16)
    # fc1 + ReLU : (TB,784)bf16 @ (784,400)bf16 -> (TB,400) f32 accumulate,
    # then bias+ReLU+downcast fused so h1 is materialized once, in bf16.
    h1 = jnp.dot(x_bf, w1_ref[...], preferred_element_type=jnp.float32)
    h1 = jnp.maximum(h1 + b1_ref[...], 0.0).astype(jnp.bfloat16)
    # fc2 + ReLU : (TB,400)bf16 @ (400,20)bf16 -> (TB,20) f32 accumulate
    h2 = jnp.dot(h1, w2_ref[...], preferred_element_type=jnp.float32)
    h2 = jnp.maximum(h2 + b2_ref[...], 0.0)
    # fc3 + sigmoid : N=1, K=20 -> VPU multiply + lane reduce (keeps the MXU free)
    logits = jnp.sum(h2 * w3_ref[...], axis=-1, keepdims=True) + b3_ref[...]
    o_ref[...] = jax.nn.sigmoid(logits)


def discriminator_forward(x, params, *, block_b=1024):
    """x: (B, 1, 28, 28) (or anything flattening to rows of 784). Returns (B, 1) f32."""
    w1, b1, w2, b2, w3, b3 = params
    x2d = x.reshape(-1, 784).astype(jnp.float32)  # == x.view(-1, 784); no-op if f32
    B = x2d.shape[0]

    # Batch tile: multiple of 128 (defensive round-up of block_b), capped near B.
    tb = min(_round_up(max(block_b, 1), 128), _round_up(max(B, 1), 128))
    n_tiles = pl.cdiv(B, tb)  # ragged last tile handled by Pallas masking (no pad pass)

    # bf16 MXU weights; biases / fc3 weight stay f32.
    w1_bf = w1.astype(jnp.bfloat16)
    w2_bf = w2.astype(jnp.bfloat16)
    b1_f = b1.astype(jnp.float32)
    b2_f = b2.astype(jnp.float32)
    w3_row = w3.reshape(1, -1).astype(jnp.float32)          # (1, 20)
    b3_f = b3.reshape(1, 1).astype(jnp.float32)             # (1, 1)

    flops = 2 * B * (784 * 400 + 400 * 20 + 20 * 1)
    bytes_accessed = (B * 784 * 4                           # x f32 stream
                      + (784 * 400 + 400 * 20) * 2          # bf16 weights
                      + (400 + 20 + 20 + 1) * 4             # biases / w3 / b3
                      + B * 4)                              # output
    cost = pl.CostEstimate(flops=flops, transcendentals=B,
                           bytes_accessed=bytes_accessed)

    const = lambda i: (0, 0)                                # resident across grid steps
    out = pl.pallas_call(
        _mlp_kernel,
        out_shape=jax.ShapeDtypeStruct((B, 1), jnp.float32),
        grid=(n_tiles,),
        in_specs=[
            pl.BlockSpec((tb, 784), lambda i: (i, 0)),      # x tile (pipelined DMA)
            pl.BlockSpec((784, 400), const),                # w1 (resident)
            pl.BlockSpec((1, 400), const),                  # b1
            pl.BlockSpec((400, 20), const),                 # w2
            pl.BlockSpec((1, 20), const),                   # b2
            pl.BlockSpec((1, 20), const),                   # w3 row
            pl.BlockSpec((1, 1), const),                    # b3
        ],
        out_specs=pl.BlockSpec((tb, 1), lambda i: (i, 0)),
        compiler_params=pltpu.CompilerParams(
            dimension_semantics=("parallel",),              # batch axis independent
            vmem_limit_bytes=32 * 1024 * 1024,
        ),
        cost_estimate=cost,
    )(x2d, w1_bf, b1_f, w2_bf, b2_f, w3_row, b3_f)

    return out


def init_params(key):
    """Deterministic init mimicking nn.Linear's U(-1/sqrt(fan_in), +1/sqrt(fan_in))."""
    def linear(key, fan_in, fan_out):
        kw, kb = jax.random.split(key)
        bound = 1.0 / jnp.sqrt(fan_in)
        # stored as (fan_in, fan_out) so the kernel computes x @ W (== x @ W_pt.T)
        w = jax.random.uniform(kw, (fan_in, fan_out), jnp.float32, -bound, bound)
        b = jax.random.uniform(kb, (1, fan_out), jnp.float32, -bound, bound)
        return w, b

    k1, k2, k3 = jax.random.split(key, 3)
    w1, b1 = linear(k1, 784, 400)
    w2, b2 = linear(k2, 400, 20)
    w3, b3 = linear(k3, 20, 1)
    return (w1, b1, w2, b2, w3, b3)


def _reference(x, params):
    w1, b1, w2, b2, w3, b3 = params
    x2d = x.reshape(-1, 784).astype(jnp.float32)
    h1 = jnp.maximum(x2d @ w1 + b1, 0.0)
    h2 = jnp.maximum(h1 @ w2 + b2, 0.0)
    return jax.nn.sigmoid(h2 @ w3 + b3)


if __name__ == "__main__":
    key = jax.random.PRNGKey(0)
    kx, kp = jax.random.split(key)

    # MNIST-like input, NCHW: (batch=4, channels=1, 28, 28) -> flattens to 784.
    x = jax.random.normal(kx, (4, 1, 28, 28), dtype=jnp.float32)
    params = init_params(kp)

    out = jax.block_until_ready(discriminator_forward(x, params))
    ref = _reference(x, params)
    assert out.shape == (4, 1), out.shape
    # bf16 MXU inputs (f32 accumulation) -> loosen tolerance vs the f32 reference.
    assert jnp.allclose(out, ref, atol=2e-2, rtol=2e-2), "mismatch vs reference (B=4)"

    # Exercise the multi-tile grid + ragged last tile (grid=(3,), 300 = 2*128 + 44).
    x2 = jax.random.normal(jax.random.PRNGKey(1), (300, 1, 28, 28), dtype=jnp.float32)
    out2 = jax.block_until_ready(discriminator_forward(x2, params, block_b=128))
    ref2 = _reference(x2, params)
    assert out2.shape == (300, 1), out2.shape
    assert jnp.allclose(out2, ref2, atol=2e-2, rtol=2e-2), "mismatch vs reference (B=300)"

    print("KERNEL_OK")
</pallas_src>

<mosaic_0001>
module attributes {stable_mosaic.version = 11 : i64} {
  func.func @_mlp_kernel(%arg0: i32, %arg1: memref<128x784xf32, #tpu.memory_space<vmem>>, %arg2: memref<784x400xbf16, #tpu.memory_space<vmem>>, %arg3: memref<1x400xf32, #tpu.memory_space<vmem>>, %arg4: memref<400x20xbf16, #tpu.memory_space<vmem>>, %arg5: memref<1x20xf32, #tpu.memory_space<vmem>>, %arg6: memref<1x20xf32, #tpu.memory_space<vmem>>, %arg7: memref<1x1xf32, #tpu.memory_space<vmem>>, %arg8: memref<128x1xf32, #tpu.memory_space<vmem>>) attributes {dimension_semantics = [#tpu.dimension_semantics<parallel>], iteration_bounds = array<i64: 1>, scalar_prefetch = 0 : i64, scratch_operands = 0 : i64, tpu.core_type = #tpu.core_type<tc>, window_params = [{transform_indices = @transform_0, window_bounds = array<i64: 128, 784>}, {pipeline_mode = #tpu.pipeline_mode<synchronous>, transform_indices = @transform_1, window_bounds = array<i64: 784, 400>}, {pipeline_mode = #tpu.pipeline_mode<synchronous>, transform_indices = @transform_2, window_bounds = array<i64: 1, 400>}, {pipeline_mode = #tpu.pipeline_mode<synchronous>, transform_indices = @transform_3, window_bounds = array<i64: 400, 20>}, {pipeline_mode = #tpu.pipeline_mode<synchronous>, transform_indices = @transform_4, window_bounds = array<i64: 1, 20>}, {pipeline_mode = #tpu.pipeline_mode<synchronous>, transform_indices = @transform_5, window_bounds = array<i64: 1, 20>}, {pipeline_mode = #tpu.pipeline_mode<synchronous>, transform_indices = @transform_6, window_bounds = array<i64: 1, 1>}, {transform_indices = @transform_7, window_bounds = array<i64: 128, 1>}]} {
    %c0 = arith.constant 0 : index
    %c0_0 = arith.constant 0 : index
    %0 = vector.load %arg1[%c0, %c0_0] : memref<128x784xf32, #tpu.memory_space<vmem>>, vector<128x784xf32>
    %1 = arith.truncf %0 : vector<128x784xf32> to vector<128x784xbf16>
    %c0_1 = arith.constant 0 : index
    %c0_2 = arith.constant 0 : index
    %2 = vector.load %arg2[%c0_1, %c0_2] : memref<784x400xbf16, #tpu.memory_space<vmem>>, vector<784x400xbf16>
    %cst = arith.constant dense<0.000000e+00> : vector<128x400xf32>
    %3 = tpu.matmul %1, %2, %cst {dimension_numbers = #tpu.dot_dimension_numbers<[1], [0], [0], [1], [0, 0, 1, 1], [], []>} : vector<128x784xbf16>, vector<784x400xbf16>, vector<128x400xf32> -> vector<128x400xf32>
    %c0_3 = arith.constant 0 : index
    %c0_4 = arith.constant 0 : index
    %4 = vector.load %arg3[%c0_3, %c0_4] : memref<1x400xf32, #tpu.memory_space<vmem>>, vector<1x400xf32>
    %5 = vector.broadcast %4 : vector<1x400xf32> to vector<128x400xf32>
    %6 = arith.addf %3, %5 : vector<128x400xf32>
    %cst_5 = arith.constant 0.000000e+00 : f32
    %7 = vector.broadcast %cst_5 : f32 to vector<128x400xf32>
    %8 = arith.maximumf %6, %7 : vector<128x400xf32>
    %9 = arith.truncf %8 : vector<128x400xf32> to vector<128x400xbf16>
    %c0_6 = arith.constant 0 : index
    %c0_7 = arith.constant 0 : index
    %10 = vector.load %arg4[%c0_6, %c0_7] : memref<400x20xbf16, #tpu.memory_space<vmem>>, vector<400x20xbf16>
    %cst_8 = arith.constant dense<0.000000e+00> : vector<128x20xf32>
    %11 = tpu.matmul %9, %10, %cst_8 {dimension_numbers = #tpu.dot_dimension_numbers<[1], [0], [0], [1], [0, 0, 1, 1], [], []>} : vector<128x400xbf16>, vector<400x20xbf16>, vector<128x20xf32> -> vector<128x20xf32>
    %c0_9 = arith.constant 0 : index
    %c0_10 = arith.constant 0 : index
    %12 = vector.load %arg5[%c0_9, %c0_10] : memref<1x20xf32, #tpu.memory_space<vmem>>, vector<1x20xf32>
    %13 = vector.broadcast %12 : vector<1x20xf32> to vector<128x20xf32>
    %14 = arith.addf %11, %13 : vector<128x20xf32>
    %cst_11 = arith.constant 0.000000e+00 : f32
    %15 = vector.broadcast %cst_11 : f32 to vector<128x20xf32>
    %16 = arith.maximumf %14, %15 : vector<128x20xf32>
    %c0_12 = arith.constant 0 : index
    %c0_13 = arith.constant 0 : index
    %17 = vector.load %arg6[%c0_12, %c0_13] : memref<1x20xf32, #tpu.memory_space<vmem>>, vector<1x20xf32>
    %18 = vector.broadcast %17 : vector<1x20xf32> to vector<128x20xf32>
    %19 = arith.mulf %16, %18 : vector<128x20xf32>
    %cst_14 = arith.constant dense<0.000000e+00> : vector<128xf32>
    %20 = vector.multi_reduction <add>, %19, %cst_14 [1] : vector<128x20xf32> to vector<128xf32>
    %21 = vector.shape_cast %20 : vector<128xf32> to vector<128x1xf32>
    %c0_15 = arith.constant 0 : index
    %c0_16 = arith.constant 0 : index
    %22 = vector.load %arg7[%c0_15, %c0_16] : memref<1x1xf32, #tpu.memory_space<vmem>>, vector<1x1xf32>
    %23 = vector.broadcast %22 : vector<1x1xf32> to vector<128x1xf32>
    %24 = arith.addf %21, %23 : vector<128x1xf32>
    %25 = arith.negf %24 : vector<128x1xf32>
    %26 = math.exp %25 : vector<128x1xf32>
    %cst_17 = arith.constant 1.000000e+00 : f32
    %27 = vector.broadcast %cst_17 : f32 to vector<128x1xf32>
    %28 = arith.addf %27, %26 : vector<128x1xf32>
    %29 = arith.divf %27, %28 : vector<128x1xf32>
    %c0_18 = arith.constant 0 : index
    %c0_19 = arith.constant 0 : index
    %30 = vector.load %arg8[%c0_18, %c0_19] : memref<128x1xf32, #tpu.memory_space<vmem>>, vector<128x1xf32>
    tpu.vector_store %arg8[%c0_18, %c0_19], %29 {strides = array<i32>} : memref<128x1xf32, #tpu.memory_space<vmem>>, vector<128x1xf32>,
    return
  }
  func.func @transform_0(%arg0: i32) -> (i32, i32) {
    %c0_i32 = arith.constant 0 : i32
    %c0_i32_0 = arith.constant 0 : i32
    return %arg0, %c0_i32 : i32, i32
  }
  func.func @transform_1(%arg0: i32) -> (i32, i32) {
    %c0_i32 = arith.constant 0 : i32
    %c0_i32_0 = arith.constant 0 : i32
    %c0_i32_1 = arith.constant 0 : i32
    return %c0_i32, %c0_i32_0 : i32, i32
  }
  func.func @transform_2(%arg0: i32) -> (i32, i32) {
    %c0_i32 = arith.constant 0 : i32
    %c0_i32_0 = arith.constant 0 : i32
    %c0_i32_1 = arith.constant 0 : i32
    return %c0_i32, %c0_i32_0 : i32, i32
  }
  func.func @transform_3(%arg0: i32) -> (i32, i32) {
    %c0_i32 = arith.constant 0 : i32
    %c0_i32_0 = arith.constant 0 : i32
    %c0_i32_1 = arith.constant 0 : i32
    return %c0_i32, %c0_i32_0 : i32, i32
  }
  func.func @transform_4(%arg0: i32) -> (i32, i32) {
    %c0_i32 = arith.constant 0 : i32
    %c0_i32_0 = arith.constant 0 : i32
    %c0_i32_1 = arith.constant 0 : i32
    return %c0_i32, %c0_i32_0 : i32, i32
  }
  func.func @transform_5(%arg0: i32) -> (i32, i32) {
    %c0_i32 = arith.constant 0 : i32
    %c0_i32_0 = arith.constant 0 : i32
    %c0_i32_1 = arith.constant 0 : i32
    return %c0_i32, %c0_i32_0 : i32, i32
  }
  func.func @transform_6(%arg0: i32) -> (i32, i32) {
    %c0_i32 = arith.constant 0 : i32
    %c0_i32_0 = arith.constant 0 : i32
    %c0_i32_1 = arith.constant 0 : i32
    return %c0_i32, %c0_i32_0 : i32, i32
  }
  func.func @transform_7(%arg0: i32) -> (i32, i32) {
    %c0_i32 = arith.constant 0 : i32
    %c0_i32_0 = arith.constant 0 : i32
    return %arg0, %c0_i32 : i32, i32
  }
}

</mosaic_0001>

<bundles_post_ra>
// kernel: tpu_custom_call.1
= control target key start
LH: loop header
LB: loop body
LE: loop exit
PB: predicated region body
PF: predicated region fallthrough
CT: control target
= control target key end

     0   :  { %s5850_s0 = inlined_call_operand.vmem [shape: f32[4,784], index: 0, kind: input, shape index: {}]   ;;  %s5851_s1 = inlined_call_operand.vmem [shape: bf16[784,400], index: 1, kind: input, shape index: {}]   ;;  %s5852_s2 = inlined_call_operand.vmem [shape: f32[1,400], index: 2, kind: input, shape index: {}]   ;;  %s5853_s3 = inlined_call_operand.vmem [shape: bf16[400,20], index: 3, kind: input, shape index: {}]   ;;  %s5854_s4 = inlined_call_operand.vmem [shape: f32[1,20], index: 4, kind: input, shape index: {}]   ;;  %s5855_s5 = inlined_call_operand.vmem [shape: f32[1,20], index: 5, kind: input, shape index: {}]   ;;  %s5856_s6 = inlined_call_operand.<no memory space> [shape: f32[1,1], index: 6, kind: input, shape index: {}]   ;;  %s5857_s7 = inlined_call_operand.vmem [shape: f32[4,1], index: 7, kind: output, shape index: {}]  }
   0x1   :  { %v12_v0 = vstv %s5856_s6 }
   0x2   :  { %13 = vst [vmem:[#allocation2] sm:$0x1] %v12_v0 }
   0x3   :  { %v4061_v1 = vld [vmem:[%s5851_s1 + $0x4] ss:$16 sps:$4 sm:$0xff]   ;;  %v4063_v2 = vld [vmem:[%s5851_s1 + $0xc] ss:$16 sps:$4 sm:$0xff]   ;;  %v4065_v3 = vld [vmem:[%s5851_s1] ss:$16 sps:$4 sm:$0xff]  }
   0x4   :  { %1788 = vmatprep.subr.bf16.mxu0 %v4061_v1  ;;  %v4066_v4 = vld [vmem:[%s5851_s1 + $0x8] ss:$16 sps:$4 sm:$0xff]   ;;  %2240 = vmatprep.subr.bf16.mxu1 %v4063_v2  ;;  %v4067_v5 = vld [vmem:[%s5851_s1 + $0x24] ss:$16 sps:$4 sm:$0xff]   ;;  %v4069_v6 = vld [vmem:[%s5851_s1 + $0x2c] ss:$16 sps:$4 sm:$0xff]  }
   0x5   :  { %1789 = vmatpush1.bf16.msra.mxu0 %v4065_v3  ;;  %2241 = vmatpush1.bf16.msra.mxu1 %v4066_v4  ;;  %v4071_v7 = vld [vmem:[%s5851_s1 + $0x20] ss:$16 sps:$4 sm:$0xff]   ;;  %v4072_v8 = vld [vmem:[%s5851_s1 + $0x28] ss:$16 sps:$4 sm:$0xff]   ;;  %v4073_v9 = vld [vmem:[%s5851_s1 + $0x44] ss:$16 sps:$4 sm:$0xff]  }
   0x6   :  { %1790 = vmatprep.subr.bf16.mxu0 %v4067_v5  ;;  %2242 = vmatprep.subr.bf16.mxu1 %v4069_v6  ;;  %v4075_v10 = vld [vmem:[%s5851_s1 + $0x4c] ss:$16 sps:$4 sm:$0xff]   ;;  %v4077_v11 = vld [vmem:[%s5851_s1 + $0x40] ss:$16 sps:$4 sm:$0xff]   ;;  %v4078_v12 = vld [vmem:[%s5851_s1 + $0x48] ss:$16 sps:$4 sm:$0xff]  }
   0x7   :  { %v4079_v13 = vld [vmem:[%s5851_s1 + $0x64] ss:$16 sps:$4 sm:$0xff]   ;;  %v4081_v14 = vld [vmem:[%s5851_s1 + $0x6c] ss:$16 sps:$4 sm:$0xff]   ;;  %v4083_v15 = vld [vmem:[%s5851_s1 + $0x60] ss:$16 sps:$4 sm:$0xff]  }
   0x8   :  { %v4084_v16 = vld [vmem:[%s5851_s1 + $0x68] ss:$16 sps:$4 sm:$0xff]   ;;  %v4085_v17 = vld [vmem:[%s5851_s1 + $0x84] ss:$16 sps:$4 sm:$0xff]   ;;  %v4087_v18 = vld [vmem:[%s5851_s1 + $0x8c] ss:$16 sps:$4 sm:$0xff]  }
   0x9   :  { %1791 = vmatpush1.bf16.msra.mxu0 %v4071_v7  ;;  %2243 = vmatpush1.bf16.msra.mxu1 %v4072_v8  ;;  %v4089_v19 = vld [vmem:[%s5851_s1 + $0x80] ss:$16 sps:$4 sm:$0xff]   ;;  %v4090_v20 = vld [vmem:[%s5851_s1 + $0x88] ss:$16 sps:$4 sm:$0xff]   ;;  %v4091_v21 = vld [vmem:[%s5851_s1 + $0xa4] ss:$16 sps:$4 sm:$0xff]  }
   0xa   :  { %1792 = vmatprep.subr.bf16.mxu0 %v4073_v9  ;;  %2244 = vmatprep.subr.bf16.mxu1 %v4075_v10  ;;  %v4093_v22 = vld [vmem:[%s5851_s1 + $0xac] ss:$16 sps:$4 sm:$0xff]   ;;  %v4095_v23 = vld [vmem:[%s5851_s1 + $0xa0] ss:$16 sps:$4 sm:$0xff]   ;;  %v4096_v24 = vld [vmem:[%s5851_s1 + $0xa8] ss:$16 sps:$4 sm:$0xff]  }
   0xb   :  { %v4097_v25 = vld [vmem:[%s5851_s1 + $0xc4] ss:$16 sps:$4 sm:$0xff]   ;;  %v4099_v26 = vld [vmem:[%s5851_s1 + $0xcc] ss:$16 sps:$4 sm:$0xff]   ;;  %v4101_v27 = vld [vmem:[%s5851_s1 + $0xc0] ss:$16 sps:$4 sm:$0xff]  }
   0xc   :  { %v4102_v28 = vld [vmem:[%s5851_s1 + $0xc8] ss:$16 sps:$4 sm:$0xff]   ;;  %v4103_v29 = vld [vmem:[%s5851_s1 + $0xe4] ss:$16 sps:$4 sm:$0xff]   ;;  %v4105_v30 = vld [vmem:[%s5851_s1 + $0xec] ss:$16 sps:$4 sm:$0xff]  }
   0xd   :  { %1793 = vmatpush1.bf16.msra.mxu0 %v4077_v11  ;;  %2245 = vmatpush1.bf16.msra.mxu1 %v4078_v12  ;;  %v4107_v31 = vld [vmem:[%s5851_s1 + $0xe0] ss:$16 sps:$4 sm:$0xff]   ;;  %v4108_v32 = vld [vmem:[%s5851_s1 + $0xe8] ss:$16 sps:$4 sm:$0xff]   ;;  %v4109_v33 = vld [vmem:[%s5851_s1 + $0x104] ss:$16 sps:$4 sm:$0xff]  }
   0xe   :  { %1794 = vmatprep.subr.bf16.mxu0 %v4079_v13  ;;  %2246 = vmatprep.subr.bf16.mxu1 %v4081_v14  ;;  %v4111_v34 = vld [vmem:[%s5851_s1 + $0x10c] ss:$16 sps:$4 sm:$0xff]   ;;  %v4113_v35 = vld [vmem:[%s5851_s1 + $0x100] ss:$16 sps:$4 sm:$0xff]   ;;  %v4114_v36 = vld [vmem:[%s5851_s1 + $0x108] ss:$16 sps:$4 sm:$0xff]  }
   0xf   :  { %v4115_v37 = vld [vmem:[%s5851_s1 + $0x124] ss:$16 sps:$4 sm:$0xff]   ;;  %v4117_v38 = vld [vmem:[%s5851_s1 + $0x12c] ss:$16 sps:$4 sm:$0xff]   ;;  %v4119_v39 = vld [vmem:[%s5851_s1 + $0x120] ss:$16 sps:$4 sm:$0xff]  }
  0x10   :  { %v4120_v40 = vld [vmem:[%s5851_s1 + $0x128] ss:$16 sps:$4 sm:$0xff]   ;;  %v4121_v41 = vld [vmem:[%s5851_s1 + $0x144] ss:$16 sps:$4 sm:$0xff]   ;;  %v4123_v42 = vld [vmem:[%s5851_s1 + $0x14c] ss:$16 sps:$4 sm:$0xff]  }
  0x11   :  { %1795 = vmatpush1.bf16.msra.mxu0 %v4083_v15  ;;  %2247 = vmatpush1.bf16.msra.mxu1 %v4084_v16  ;;  %v4125_v43 = vld [vmem:[%s5851_s1 + $0x140] ss:$16 sps:$4 sm:$0xff]   ;;  %v4126_v44 = vld [vmem:[%s5851_s1 + $0x148] ss:$16 sps:$4 sm:$0xff]   ;;  %v4127_v45 = vld [vmem:[%s5851_s1 + $0x164] ss:$16 sps:$4 sm:$0xff]  }
  0x12   :  { %1796 = vmatprep.subr.bf16.mxu0 %v4085_v17  ;;  %2248 = vmatprep.subr.bf16.mxu1 %v4087_v18  ;;  %v4129_v46 = vld [vmem:[%s5851_s1 + $0x16c] ss:$16 sps:$4 sm:$0xff]   ;;  %v4131_v47 = vld [vmem:[%s5851_s1 + $0x160] ss:$16 sps:$4 sm:$0xff]   ;;  %v4132_v48 = vld [vmem:[%s5851_s1 + $0x168] ss:$16 sps:$4 sm:$0xff]  }
  0x13   :  { %v4133_v49 = vld [vmem:[%s5851_s1 + $0x184] ss:$16 sps:$4 sm:$0xff]   ;;  %v4135_v50 = vld [vmem:[%s5851_s1 + $0x18c] ss:$16 sps:$4 sm:$0xff]   ;;  %v4137_v53 = vld [vmem:[%s5851_s1 + $0x180] ss:$16 sps:$4 sm:$0xff]  }
  0x14   :  { %v4159_v51 = vld [vmem:[%s5850_s0 + $0x4] ss:$28 sps:$4 sm:$0xff]   ;;  %v4162_v52 = vld [vmem:[%s5850_s0 + $0x3c] ss:$28 sps:$4 sm:$0xff]   ;;  %v4175_v8 = vld [vmem:[%s5850_s0 + $0x74] ss:$28 sps:$4 sm:$0xff]  }
  0x15   :  { %1797 = vmatpush1.bf16.msra.mxu0 %v4089_v19  ;;  %2249 = vmatpush1.bf16.msra.mxu1 %v4090_v20  ;;  %v4138_v54 = vld [vmem:[%s5851_s1 + $0x188] ss:$16 sps:$4 sm:$0xff]   ;;  %v510_v55 = vpack.c.bf16 %v4162_v52, %v4159_v51  ;;  %v4139_v56 = vld [vmem:[%s5851_s1 + $0x1a4] ss:$16 sps:$4 sm:$0xff]   ;;  %v4141_v57 = vld [vmem:[%s5851_s1 + $0x1ac] ss:$16 sps:$4 sm:$0xff]  }
  0x16   :  { %1798 = vmatprep.subr.bf16.mxu0 %v4091_v21  ;;  %2250 = vmatprep.subr.bf16.mxu1 %v4093_v22  ;;  %v4143_v58 = vld [vmem:[%s5851_s1 + $0x1a0] ss:$16 sps:$4 sm:$0xff]   ;;  %v4144_v59 = vld [vmem:[%s5851_s1 + $0x1a8] ss:$16 sps:$4 sm:$0xff]   ;;  %v4145_v60 = vld [vmem:[%s5851_s1 + $0x1c4] ss:$16 sps:$4 sm:$0xff]  }
  0x17   :  { %1820 = vmatprep.mubr.bf16.mxu0 %v510_v55  ;;  %2272 = vmatprep.mubr.bf16.mxu1 %v510_v55  ;;  %v4147_v61 = vld [vmem:[%s5851_s1 + $0x1cc] ss:$16 sps:$4 sm:$0xff]   ;;  %v4149_v62 = vld [vmem:[%s5851_s1 + $0x1c0] ss:$16 sps:$4 sm:$0xff]   ;;  %v4150_v63 = vld [vmem:[%s5851_s1 + $0x1c8] ss:$16 sps:$4 sm:$0xff]  }
  0x18   :  { %v4151_v0 = vld [vmem:[%s5851_s1 + $0x1e4] ss:$16 sps:$4 sm:$0xff]   ;;  %v4153_v1 = vld [vmem:[%s5851_s1 + $0x1ec] ss:$16 sps:$4 sm:$0xff]   ;;  %v4155_v4 = vld [vmem:[%s5851_s1 + $0x1e0] ss:$16 sps:$4 sm:$0xff]  }
  0x19   :  { %1799 = vmatpush1.bf16.msra.mxu0 %v4095_v23  ;;  %2251 = vmatpush1.bf16.msra.mxu1 %v4096_v24  ;;  %v4157_v2 = vld [vmem:[%s5850_s0] ss:$28 sps:$4 sm:$0xff]   ;;  %v4160_v3 = vld [vmem:[%s5850_s0 + $0x38] ss:$28 sps:$4 sm:$0xff]   ;;  %v4177_v9 = vld [vmem:[%s5850_s0 + $0xac] ss:$28 sps:$4 sm:$0xff]  }
  0x1a   :  { %1800 = vmatprep.subr.bf16.mxu0 %v4097_v25  ;;  %2252 = vmatprep.subr.bf16.mxu1 %v4099_v26  ;;  %v4156_v5 = vld [vmem:[%s5851_s1 + $0x1e8] ss:$16 sps:$4 sm:$0xff]   ;;  %v4165_v6 = vld [vmem:[%s5851_s1 + $0x204] ss:$16 sps:$4 sm:$0xff]   ;;  %v4168_v7 = vld [vmem:[%s5851_s1 + $0x20c] ss:$16 sps:$4 sm:$0xff]   ;;  %v509_v10 = vpack.c.bf16 %v4160_v3, %v4157_v2  ;;  %v517_v15 = vpack.c.bf16 %v4177_v9, %v4175_v8 }
  0x1b   :  { %v4163_v11 = vld [vmem:[%s5851_s1 + $0x200] ss:$16 sps:$4 sm:$0xff]   ;;  %v4166_v12 = vld [vmem:[%s5851_s1 + $0x208] ss:$16 sps:$4 sm:$0xff]   ;;  %v4171_v13 = vld [vmem:[%s5851_s1 + $0x224] ss:$16 sps:$4 sm:$0xff]  }
  0x1c   :  { %v4174_v14 = vld [vmem:[%s5851_s1 + $0x22c] ss:$16 sps:$4 sm:$0xff]   ;;  %v4180_v17 = vld [vmem:[%s5850_s0 + $0xa8] ss:$28 sps:$4 sm:$0xff]   ;;  %v4169_v18 = vld [vmem:[%s5851_s1 + $0x220] ss:$16 sps:$4 sm:$0xff]  }
  0x1d   :  { %1801 = vmatpush1.bf16.msra.mxu0 %v4101_v27  ;;  %2253 = vmatpush1.bf16.msra.mxu1 %v4102_v28  ;;  %v4179_v16 = vld [vmem:[%s5850_s0 + $0x70] ss:$28 sps:$4 sm:$0xff]   ;;  %v4172_v19 = vld [vmem:[%s5851_s1 + $0x228] ss:$16 sps:$4 sm:$0xff]   ;;  %v4183_v20 = vld [vmem:[%s5851_s1 + $0x244] ss:$16 sps:$4 sm:$0xff]  }
  0x1e   :  { %1802 = vmatprep.subr.bf16.mxu0 %v4103_v29  ;;  %2254 = vmatprep.subr.bf16.mxu1 %v4105_v30  ;;  %v4186_v21 = vld [vmem:[%s5851_s1 + $0x24c] ss:$16 sps:$4 sm:$0xff]   ;;  %v4193_v22 = vld [vmem:[%s5850_s0 + $0xe4] ss:$28 sps:$4 sm:$0xff]   ;;  %v516_v24 = vpack.c.bf16 %v4180_v17, %v4179_v16  ;;  %v4184_v26 = vld [vmem:[%s5851_s1 + $0x248] ss:$16 sps:$4 sm:$0xff]  }
  0x1f   :  { %v4195_v23 = vld [vmem:[%s5850_s0 + $0x11c] ss:$28 sps:$4 sm:$0xff]   ;;  %v4181_v25 = vld [vmem:[%s5851_s1 + $0x240] ss:$16 sps:$4 sm:$0xff]   ;;  %v4189_v27 = vld [vmem:[%s5851_s1 + $0x264] ss:$16 sps:$4 sm:$0xff]  }
  0x20   :  { %v4192_v28 = vld [vmem:[%s5851_s1 + $0x26c] ss:$16 sps:$4 sm:$0xff]   ;;  %v524_v29 = vpack.c.bf16 %v4195_v23, %v4193_v22  ;;  %v4225_v55 = vld [vmem:[%s5851_s1 + $0x2e4] ss:$16 sps:$4 sm:$0xff]   ;;  %v4235_v3 = vld [vmem:[%s5851_s1 + $0x300] ss:$16 sps:$4 sm:$0xff]  }
  0x21   :  { %1803 = vmatpush1.bf16.msra.mxu0 %v4107_v31  ;;  %2255 = vmatpush1.bf16.msra.mxu1 %v4108_v32  ;;  %v4197_v30 = vld [vmem:[%s5850_s0 + $0xe0] ss:$28 sps:$4 sm:$0xff]   ;;  %v4198_v31 = vld [vmem:[%s5850_s0 + $0x118] ss:$28 sps:$4 sm:$0xff]   ;;  %v4251_v8 = vld [vmem:[%s5850_s0 + $0x230] ss:$28 sps:$4 sm:$0xff]  }
  0x22   :  { %1804 = vmatprep.subr.bf16.mxu0 %v4109_v33  ;;  %2256 = vmatprep.subr.bf16.mxu1 %v4111_v34  ;;  %v4187_v32 = vld [vmem:[%s5851_s1 + $0x260] ss:$16 sps:$4 sm:$0xff]   ;;  %v4190_v33 = vld [vmem:[%s5851_s1 + $0x268] ss:$16 sps:$4 sm:$0xff]   ;;  %v4201_v34 = vld [vmem:[%s5851_s1 + $0x284] ss:$16 sps:$4 sm:$0xff]  }
  0x23   :  { %v4231_v51 = vld [vmem:[%s5850_s0 + $0x1fc] ss:$28 sps:$4 sm:$0xff]   ;;  %v4252_v9 = vld [vmem:[%s5850_s0 + $0x268] ss:$28 sps:$4 sm:$0xff]   ;;  %v4253_v17 = vld [vmem:[%s5851_s1 + $0x340] ss:$16 sps:$4 sm:$0xff]  }
  0x24   :  { %v544_v16 = vpack.c.bf16 %v4252_v9, %v4251_v8  ;;  %v4269_v22 = vld [vmem:[%s5850_s0 + $0x2a0] ss:$28 sps:$4 sm:$0xff]   ;;  %v4270_v23 = vld [vmem:[%s5850_s0 + $0x2d8] ss:$28 sps:$4 sm:$0xff]   ;;  %vm1763_vm0 = vcmask 130048   ;;  %vm3252_vm1 = vcmask 162816  }
  0x25   :  { %1805 = vmatpush1.bf16.msra.mxu0 %v4113_v35  ;;  %2257 = vmatpush1.bf16.msra.mxu1 %v4114_v36  ;;  %v4204_v35 = vld [vmem:[%s5851_s1 + $0x28c] ss:$16 sps:$4 sm:$0xff]   ;;  %v4211_v36 = vld [vmem:[%s5850_s0 + $0x154] ss:$28 sps:$4 sm:$0xff]   ;;  %vm3420_vm2 = vcmask 7168  }
  0x26   :  { %1806 = vmatprep.subr.bf16.mxu0 %v4115_v37  ;;  %2258 = vmatprep.subr.bf16.mxu1 %v4117_v38  ;;  %v4213_v37 = vld [vmem:[%s5850_s0 + $0x18c] ss:$28 sps:$4 sm:$0xff]   ;;  %v523_v38 = vpack.c.bf16 %v4198_v31, %v4197_v30  ;;  %v551_v30 = vpack.c.bf16 %v4270_v23, %v4269_v22  ;;  %v4271_v31 = vld [vmem:[%s5851_s1 + $0x380] ss:$16 sps:$4 sm:$0xff]  }
  0x27   :  { %v4325_v9 = vld [vmem:[%s5851_s1 + $0x440] ss:$16 sps:$4 sm:$0xff]  }
  0x28   :  { %v4343_v23 = vld [vmem:[%s5851_s1 + $0x480] ss:$16 sps:$4 sm:$0xff]  }
  0x29   :  { %1807 = vmatpush1.bf16.msra.mxu0 %v4119_v39  ;;  %2259 = vmatpush1.bf16.msra.mxu1 %v4120_v40  ;;  %v4199_v39 = vld [vmem:[%s5851_s1 + $0x280] ss:$16 sps:$4 sm:$0xff]   ;;  %v4202_v40 = vld [vmem:[%s5851_s1 + $0x288] ss:$16 sps:$4 sm:$0xff]  }
  0x2a   :  { %1808 = vmatprep.subr.bf16.mxu0 %v4121_v41  ;;  %2260 = vmatprep.subr.bf16.mxu1 %v4123_v42  ;;  %v4207_v41 = vld [vmem:[%s5851_s1 + $0x2a4] ss:$16 sps:$4 sm:$0xff]   ;;  %v4210_v42 = vld [vmem:[%s5851_s1 + $0x2ac] ss:$16 sps:$4 sm:$0xff]  }
  0x2d   :  { %1809 = vmatpush1.bf16.msra.mxu0 %v4125_v43  ;;  %2261 = vmatpush1.bf16.msra.mxu1 %v4126_v44  ;;  %v531_v43 = vpack.c.bf16 %v4213_v37, %v4211_v36  ;;  %v4215_v44 = vld [vmem:[%s5850_s0 + $0x150] ss:$28 sps:$4 sm:$0xff]   ;;  %v4288_v37 = vld [vmem:[%s5850_s0 + $0x348] ss:$28 sps:$4 sm:$0xff]  }
  0x2e   :  { %1810 = vmatprep.subr.bf16.mxu0 %v4127_v45  ;;  %2262 = vmatprep.subr.bf16.mxu1 %v4129_v46  ;;  %v4216_v45 = vld [vmem:[%s5850_s0 + $0x188] ss:$28 sps:$4 sm:$0xff]   ;;  %v4205_v46 = vld [vmem:[%s5851_s1 + $0x2a0] ss:$16 sps:$4 sm:$0xff]  }
  0x2f   :  { %v530_v52 = vpack.c.bf16 %v4216_v45, %v4215_v44  ;;  %v4287_v36 = vld [vmem:[%s5850_s0 + $0x310] ss:$28 sps:$4 sm:$0xff]  }
  0x30   :  { %v558_v44 = vpack.c.bf16 %v4288_v37, %v4287_v36  ;;  %v4289_v45 = vld [vmem:[%s5851_s1 + $0x3c0] ss:$16 sps:$4 sm:$0xff]  }
  0x31   :  { %1811 = vmatpush1.bf16.msra.mxu0 %v4131_v47  ;;  %2263 = vmatpush1.bf16.msra.mxu1 %v4132_v48  ;;  %v4208_v47 = vld [vmem:[%s5851_s1 + $0x2a8] ss:$16 sps:$4 sm:$0xff]   ;;  %v4219_v48 = vld [vmem:[%s5851_s1 + $0x2c4] ss:$16 sps:$4 sm:$0xff]   ;;  %v4361_v37 = vld [vmem:[%s5851_s1 + $0x4c0] ss:$16 sps:$4 sm:$0xff]  }
  0x32   :  { %1812 = vmatprep.subr.bf16.mxu0 %v4133_v49  ;;  %2264 = vmatprep.subr.bf16.mxu1 %v4135_v50  ;;  %v4222_v49 = vld [vmem:[%s5851_s1 + $0x2cc] ss:$16 sps:$4 sm:$0xff]   ;;  %v4229_v50 = vld [vmem:[%s5850_s0 + $0x1c4] ss:$28 sps:$4 sm:$0xff]  }
  0x35   :  { %1813 = vmatpush1.bf16.msra.mxu0 %v4137_v53  ;;  %2265 = vmatpush1.bf16.msra.mxu1 %v4138_v54  ;;  %v4217_v53 = vld [vmem:[%s5851_s1 + $0x2c0] ss:$16 sps:$4 sm:$0xff]   ;;  %v4220_v54 = vld [vmem:[%s5851_s1 + $0x2c8] ss:$16 sps:$4 sm:$0xff]  }
  0x36   :  { %1814 = vmatprep.subr.bf16.mxu0 %v4139_v56  ;;  %2266 = vmatprep.subr.bf16.mxu1 %v4141_v57  ;;  %v4228_v56 = vld [vmem:[%s5851_s1 + $0x2ec] ss:$16 sps:$4 sm:$0xff]   ;;  %v538_v57 = vpack.c.bf16 %v4231_v51, %v4229_v50 }
  0x37   :  { %v4304_v50 = vld [vmem:[%s5850_s0 + $0x40] ss:$28 sps:$4 sm:$0xff]  }
  0x39   :  { %1815 = vmatpush1.bf16.msra.mxu0 %v4143_v58  ;;  %2267 = vmatpush1.bf16.msra.mxu1 %v4144_v59  ;;  %v4233_v58 = vld [vmem:[%s5850_s0 + $0x1c0] ss:$28 sps:$4 sm:$0xff]   ;;  %v4234_v59 = vld [vmem:[%s5850_s0 + $0x1f8] ss:$28 sps:$4 sm:$0xff]  }
  0x3a   :  { %1816 = vmatprep.subr.bf16.mxu0 %v4145_v60  ;;  %2268 = vmatprep.subr.bf16.mxu1 %v4147_v61  ;;  %v4223_v60 = vld [vmem:[%s5851_s1 + $0x2e0] ss:$16 sps:$4 sm:$0xff]   ;;  %v4226_v61 = vld [vmem:[%s5851_s1 + $0x2e8] ss:$16 sps:$4 sm:$0xff]   ;;  %v537_v2 = vpack.c.bf16 %v4234_v59, %v4233_v58 }
  0x3b   :  { %v4307_v59 = vld [vmem:[%s5851_s1 + $0x400] ss:$16 sps:$4 sm:$0xff]  }
  0x3d   :  { %1817 = vmatpush1.bf16.msra.mxu0 %v4149_v62  ;;  %2269 = vmatpush1.bf16.msra.mxu1 %v4150_v63  ;;  %v4237_v62 = vld [vmem:[%s5851_s1 + $0x304] ss:$16 sps:$4 sm:$0xff]   ;;  %v4240_v63 = vld [vmem:[%s5851_s1 + $0x30c] ss:$16 sps:$4 sm:$0xff]  }
  0x3e   :  { %1818 = vmatprep.subr.bf16.mxu0 %v4151_v0  ;;  %2270 = vmatprep.subr.bf16.mxu1 %v4153_v1  ;;  %v4247_v0 = vld [vmem:[%s5850_s0 + $0x234] ss:$28 sps:$4 sm:$0xff]   ;;  %v4249_v1 = vld [vmem:[%s5850_s0 + $0x26c] ss:$28 sps:$4 sm:$0xff]  }
  0x41   :  { %1819 = vmatpush1.bf16.msra.mxu0 %v4155_v4  ;;  %2271 = vmatpush1.bf16.msra.mxu1 %v4156_v5  ;;  %v4238_v4 = vld [vmem:[%s5851_s1 + $0x308] ss:$16 sps:$4 sm:$0xff]   ;;  %v4243_v5 = vld [vmem:[%s5851_s1 + $0x324] ss:$16 sps:$4 sm:$0xff]  }
  0x42   :  { %1901 = vmatprep.subr.bf16.mxu0 %v4165_v6  ;;  %2353 = vmatprep.subr.bf16.mxu1 %v4168_v7  ;;  %v4246_v6 = vld [vmem:[%s5851_s1 + $0x32c] ss:$16 sps:$4 sm:$0xff]   ;;  %v545_v7 = vpack.c.bf16 %v4249_v1, %v4247_v0  ;;  %v4323_v0 = vld [vmem:[%s5850_s0 + $0x78] ss:$28 sps:$4 sm:$0xff]  }
  0x43   :  { %v4324_v1 = vld [vmem:[%s5850_s0 + $0xb0] ss:$28 sps:$4 sm:$0xff]  }
  0x44   :  { %1821 = vmatmul.mubr.bf16.vlgmr.msra.gmra.mrb[0].mxu0 %v509_v10  ;;  %2273 = vmatmul.mubr.bf16.vlgmr.msra.gmra.mrb[0].mxu1 %v509_v10  ;;  %v4241_v10 = vld [vmem:[%s5851_s1 + $0x320] ss:$16 sps:$4 sm:$0xff]   ;;  %v518_v8 = vpack.c.bf16 %v4324_v1, %v4323_v0 }
  0x45   :  { %1902 = vmatpush1.bf16.msra.mxu0 %v4163_v11  ;;  %2354 = vmatpush1.bf16.msra.mxu1 %v4166_v12  ;;  %v4244_v11 = vld [vmem:[%s5851_s1 + $0x328] ss:$16 sps:$4 sm:$0xff]   ;;  %v4255_v12 = vld [vmem:[%s5851_s1 + $0x344] ss:$16 sps:$4 sm:$0xff]   ;;  %v4397_v1 = vld [vmem:[%s5851_s1 + $0x540] ss:$16 sps:$4 sm:$0xff]  }
  0x46   :  { %1903 = vmatprep.subr.bf16.mxu0 %v4171_v13  ;;  %2355 = vmatprep.subr.bf16.mxu1 %v4174_v14  ;;  %v4258_v13 = vld [vmem:[%s5851_s1 + $0x34c] ss:$16 sps:$4 sm:$0xff]   ;;  %v4265_v14 = vld [vmem:[%s5850_s0 + $0x2a4] ss:$28 sps:$4 sm:$0xff]  }
  0x47   :  { %1830 = vmatprep.mubr.bf16.mxu0 %v517_v15  ;;  %2282 = vmatprep.mubr.bf16.mxu1 %v517_v15  ;;  %v4267_v15 = vld [vmem:[%s5850_s0 + $0x2dc] ss:$28 sps:$4 sm:$0xff]  }
  0x49   :  { %1904 = vmatpush1.bf16.msra.mxu0 %v4169_v18  ;;  %2356 = vmatpush1.bf16.msra.mxu1 %v4172_v19  ;;  %v4256_v18 = vld [vmem:[%s5851_s1 + $0x348] ss:$16 sps:$4 sm:$0xff]   ;;  %v4261_v19 = vld [vmem:[%s5851_s1 + $0x364] ss:$16 sps:$4 sm:$0xff]  }
  0x4a   :  { %1905 = vmatprep.subr.bf16.mxu0 %v4183_v20  ;;  %2357 = vmatprep.subr.bf16.mxu1 %v4186_v21  ;;  %v4264_v20 = vld [vmem:[%s5851_s1 + $0x36c] ss:$16 sps:$4 sm:$0xff]   ;;  %v552_v21 = vpack.c.bf16 %v4267_v15, %v4265_v14  ;;  %v4341_v14 = vld [vmem:[%s5850_s0 + $0xe8] ss:$28 sps:$4 sm:$0xff]  }
  0x4b   :  { %v4342_v15 = vld [vmem:[%s5850_s0 + $0x120] ss:$28 sps:$4 sm:$0xff]  }
  0x4c   :  { %1831 = vmatmul.mubr.bf16.gmra.mrb[4].mxu0 %v516_v24  ;;  %2283 = vmatmul.mubr.bf16.gmra.mrb[4].mxu1 %v516_v24  ;;  %v4259_v24 = vld [vmem:[%s5851_s1 + $0x360] ss:$16 sps:$4 sm:$0xff]   ;;  %v525_v22 = vpack.c.bf16 %v4342_v15, %v4341_v14 }
  0x4d   :  { %1906 = vmatpush1.bf16.msra.mxu0 %v4181_v25  ;;  %2358 = vmatpush1.bf16.msra.mxu1 %v4184_v26  ;;  %v4262_v25 = vld [vmem:[%s5851_s1 + $0x368] ss:$16 sps:$4 sm:$0xff]   ;;  %v4273_v26 = vld [vmem:[%s5851_s1 + $0x384] ss:$16 sps:$4 sm:$0xff]   ;;  %v4415_v15 = vld [vmem:[%s5851_s1 + $0x580] ss:$16 sps:$4 sm:$0xff]  }
  0x4e   :  { %1907 = vmatprep.subr.bf16.mxu0 %v4189_v27  ;;  %2359 = vmatprep.subr.bf16.mxu1 %v4192_v28  ;;  %v4276_v27 = vld [vmem:[%s5851_s1 + $0x38c] ss:$16 sps:$4 sm:$0xff]   ;;  %v4283_v28 = vld [vmem:[%s5850_s0 + $0x314] ss:$28 sps:$4 sm:$0xff]  }
  0x4f   :  { %1840 = vmatprep.mubr.bf16.mxu0 %v524_v29  ;;  %2292 = vmatprep.mubr.bf16.mxu1 %v524_v29  ;;  %v4285_v29 = vld [vmem:[%s5850_s0 + $0x34c] ss:$28 sps:$4 sm:$0xff]  }
  0x51   :  { %1908 = vmatpush1.bf16.msra.mxu0 %v4187_v32  ;;  %2360 = vmatpush1.bf16.msra.mxu1 %v4190_v33  ;;  %v4274_v32 = vld [vmem:[%s5851_s1 + $0x388] ss:$16 sps:$4 sm:$0xff]   ;;  %v4279_v33 = vld [vmem:[%s5851_s1 + $0x3a4] ss:$16 sps:$4 sm:$0xff]  }
  0x52   :  { %1909 = vmatprep.subr.bf16.mxu0 %v4201_v34  ;;  %2361 = vmatprep.subr.bf16.mxu1 %v4204_v35  ;;  %v4282_v34 = vld [vmem:[%s5851_s1 + $0x3ac] ss:$16 sps:$4 sm:$0xff]   ;;  %v559_v35 = vpack.c.bf16 %v4285_v29, %v4283_v28  ;;  %v4359_v28 = vld [vmem:[%s5850_s0 + $0x158] ss:$28 sps:$4 sm:$0xff]  }
  0x53   :  { %v4360_v29 = vld [vmem:[%s5850_s0 + $0x190] ss:$28 sps:$4 sm:$0xff]  }
  0x54   :  { %1841 = vmatmul.mubr.bf16.gmra.mrb[8].mxu0 %v523_v38  ;;  %2293 = vmatmul.mubr.bf16.gmra.mrb[8].mxu1 %v523_v38  ;;  %v4277_v38 = vld [vmem:[%s5851_s1 + $0x3a0] ss:$16 sps:$4 sm:$0xff]   ;;  %v532_v36 = vpack.c.bf16 %v4360_v29, %v4359_v28 }
  0x55   :  { %1910 = vmatpush1.bf16.msra.mxu0 %v4199_v39  ;;  %2362 = vmatpush1.bf16.msra.mxu1 %v4202_v40  ;;  %v4280_v39 = vld [vmem:[%s5851_s1 + $0x3a8] ss:$16 sps:$4 sm:$0xff]   ;;  %v4291_v40 = vld [vmem:[%s5851_s1 + $0x3c4] ss:$16 sps:$4 sm:$0xff]   ;;  %v4433_v29 = vld [vmem:[%s5851_s1 + $0x5c0] ss:$16 sps:$4 sm:$0xff]  }
  0x56   :  { %1911 = vmatprep.subr.bf16.mxu0 %v4207_v41  ;;  %2363 = vmatprep.subr.bf16.mxu1 %v4210_v42  ;;  %v4294_v41 = vld [vmem:[%s5851_s1 + $0x3cc] ss:$16 sps:$4 sm:$0xff]  }
  0x57   :  { %1850 = vmatprep.mubr.bf16.mxu0 %v531_v43  ;;  %2302 = vmatprep.mubr.bf16.mxu1 %v531_v43  ;;  %v4303_v42 = vld [vmem:[%s5850_s0 + $0xc] ss:$28 sps:$4 sm:$0xff]   ;;  %v4306_v43 = vld [vmem:[%s5850_s0 + $0x44] ss:$28 sps:$4 sm:$0xff]  }
  0x58   :  { %v512_v51 = vpack.c.bf16 %v4306_v43, %v4303_v42  ;;  %v4377_v42 = vld [vmem:[%s5850_s0 + $0x1c8] ss:$28 sps:$4 sm:$0xff]   ;;  %v4378_v43 = vld [vmem:[%s5850_s0 + $0x200] ss:$28 sps:$4 sm:$0xff]  }
  0x59   :  { %1912 = vmatpush1.bf16.msra.mxu0 %v4205_v46  ;;  %2364 = vmatpush1.bf16.msra.mxu1 %v4208_v47  ;;  %v4292_v46 = vld [vmem:[%s5851_s1 + $0x3c8] ss:$16 sps:$4 sm:$0xff]   ;;  %v4297_v47 = vld [vmem:[%s5851_s1 + $0x3e4] ss:$16 sps:$4 sm:$0xff]  }
  0x5a   :  { %1913 = vmatprep.subr.bf16.mxu0 %v4219_v48  ;;  %2365 = vmatprep.subr.bf16.mxu1 %v4222_v49  ;;  %v4300_v48 = vld [vmem:[%s5851_s1 + $0x3ec] ss:$16 sps:$4 sm:$0xff]   ;;  %v4301_v49 = vld [vmem:[%s5850_s0 + $0x8] ss:$28 sps:$4 sm:$0xff]  }
  0x5b   :  { %v511_v58 = vpack.c.bf16 %v4304_v50, %v4301_v49  ;;  %v4393_v49 = vld [vmem:[%s5850_s0 + $0x274] ss:$28 sps:$4 sm:$0xff]   ;;  %v539_v50 = vpack.c.bf16 %v4378_v43, %v4377_v42 }
  0x5c   :  { %1851 = vmatmul.mubr.bf16.gmra.mrb[12].mxu0 %v530_v52  ;;  %2303 = vmatmul.mubr.bf16.gmra.mrb[12].mxu1 %v530_v52  ;;  %v4295_v52 = vld [vmem:[%s5851_s1 + $0x3e0] ss:$16 sps:$4 sm:$0xff]  }
  0x5d   :  { %1914 = vmatpush1.bf16.msra.mxu0 %v4217_v53  ;;  %2366 = vmatpush1.bf16.msra.mxu1 %v4220_v54  ;;  %v4298_v53 = vld [vmem:[%s5851_s1 + $0x3e8] ss:$16 sps:$4 sm:$0xff]   ;;  %v4309_v54 = vld [vmem:[%s5851_s1 + $0x404] ss:$16 sps:$4 sm:$0xff]   ;;  %v4451_v43 = vld [vmem:[%s5851_s1 + $0x600] ss:$16 sps:$4 sm:$0xff]  }
  0x5e   :  { %1915 = vmatprep.subr.bf16.mxu0 %v4225_v55  ;;  %2367 = vmatprep.subr.bf16.mxu1 %v4228_v56  ;;  %v4312_v55 = vld [vmem:[%s5851_s1 + $0x40c] ss:$16 sps:$4 sm:$0xff]  }
  0x5f   :  { %1860 = vmatprep.mubr.bf16.mxu0 %v538_v57  ;;  %2312 = vmatprep.mubr.bf16.mxu1 %v538_v57  ;;  %v4319_v56 = vld [vmem:[%s5850_s0 + $0x7c] ss:$28 sps:$4 sm:$0xff]   ;;  %v4321_v57 = vld [vmem:[%s5850_s0 + $0xb4] ss:$28 sps:$4 sm:$0xff]  }
  0x61   :  { %1916 = vmatpush1.bf16.msra.mxu0 %v4223_v60  ;;  %2368 = vmatpush1.bf16.msra.mxu1 %v4226_v61  ;;  %v4310_v60 = vld [vmem:[%s5851_s1 + $0x408] ss:$16 sps:$4 sm:$0xff]   ;;  %v4315_v61 = vld [vmem:[%s5851_s1 + $0x424] ss:$16 sps:$4 sm:$0xff]  }
  0x62   :  { %1917 = vmatprep.subr.bf16.mxu0 %v4237_v62  ;;  %2369 = vmatprep.subr.bf16.mxu1 %v4240_v63  ;;  %v4318_v62 = vld [vmem:[%s5851_s1 + $0x42c] ss:$16 sps:$4 sm:$0xff]   ;;  %v519_v63 = vpack.c.bf16 %v4321_v57, %v4319_v56  ;;  %v4395_v56 = vld [vmem:[%s5850_s0 + $0x238] ss:$28 sps:$4 sm:$0xff]  }
  0x63   :  { %v4396_v57 = vld [vmem:[%s5850_s0 + $0x270] ss:$28 sps:$4 sm:$0xff]  }
  0x64   :  { %1861 = vmatmul.mubr.bf16.gmra.mrb[16].mxu0 %v537_v2  ;;  %2313 = vmatmul.mubr.bf16.gmra.mrb[16].mxu1 %v537_v2  ;;  %v4313_v2 = vld [vmem:[%s5851_s1 + $0x420] ss:$16 sps:$4 sm:$0xff]   ;;  %v546_v0 = vpack.c.bf16 %v4396_v57, %v4395_v56  ;;  %v4471_v56 = vld [vmem:[%s5850_s0 + $0x19c] ss:$28 sps:$4 sm:$0xff]  }
  0x65   :  { %1918 = vmatpush1.bf16.msra.mxu0 %v4235_v3  ;;  %2370 = vmatpush1.bf16.msra.mxu1 %v4238_v4  ;;  %v4316_v3 = vld [vmem:[%s5851_s1 + $0x428] ss:$16 sps:$4 sm:$0xff]   ;;  %v4327_v4 = vld [vmem:[%s5851_s1 + $0x444] ss:$16 sps:$4 sm:$0xff]  }
  0x66   :  { %1919 = vmatprep.subr.bf16.mxu0 %v4243_v5  ;;  %2371 = vmatprep.subr.bf16.mxu1 %v4246_v6  ;;  %v4330_v5 = vld [vmem:[%s5851_s1 + $0x44c] ss:$16 sps:$4 sm:$0xff]  }
  0x67   :  { %1870 = vmatprep.mubr.bf16.mxu0 %v545_v7  ;;  %2322 = vmatprep.mubr.bf16.mxu1 %v545_v7  ;;  %v4337_v6 = vld [vmem:[%s5850_s0 + $0xec] ss:$28 sps:$4 sm:$0xff]   ;;  %v4339_v7 = vld [vmem:[%s5850_s0 + $0x124] ss:$28 sps:$4 sm:$0xff]  }
  0x69   :  { %1920 = vmatpush1.bf16.msra.mxu0 %v4241_v10  ;;  %2372 = vmatpush1.bf16.msra.mxu1 %v4244_v11  ;;  %v4328_v10 = vld [vmem:[%s5851_s1 + $0x448] ss:$16 sps:$4 sm:$0xff]   ;;  %v4333_v11 = vld [vmem:[%s5851_s1 + $0x464] ss:$16 sps:$4 sm:$0xff]  }
  0x6a   :  { %1921 = vmatprep.subr.bf16.mxu0 %v4255_v12  ;;  %2373 = vmatprep.subr.bf16.mxu1 %v4258_v13  ;;  %v4336_v12 = vld [vmem:[%s5851_s1 + $0x46c] ss:$16 sps:$4 sm:$0xff]   ;;  %v526_v13 = vpack.c.bf16 %v4339_v7, %v4337_v6  ;;  %v4413_v6 = vld [vmem:[%s5850_s0 + $0x2a8] ss:$28 sps:$4 sm:$0xff]  }
  0x6b   :  { %v4414_v7 = vld [vmem:[%s5850_s0 + $0x2e0] ss:$28 sps:$4 sm:$0xff]  }
  0x6c   :  { %1871 = vmatmul.mubr.bf16.gmra.mrb[20].mxu0 %v544_v16  ;;  %2323 = vmatmul.mubr.bf16.gmra.mrb[20].mxu1 %v544_v16  ;;  %v4331_v16 = vld [vmem:[%s5851_s1 + $0x460] ss:$16 sps:$4 sm:$0xff]   ;;  %v553_v14 = vpack.c.bf16 %v4414_v7, %v4413_v6 }
  0x6d   :  { %1922 = vmatpush1.bf16.msra.mxu0 %v4253_v17  ;;  %2374 = vmatpush1.bf16.msra.mxu1 %v4256_v18  ;;  %v4334_v17 = vld [vmem:[%s5851_s1 + $0x468] ss:$16 sps:$4 sm:$0xff]   ;;  %v4345_v18 = vld [vmem:[%s5851_s1 + $0x484] ss:$16 sps:$4 sm:$0xff]  }
  0x6e   :  { %1923 = vmatprep.subr.bf16.mxu0 %v4261_v19  ;;  %2375 = vmatprep.subr.bf16.mxu1 %v4264_v20  ;;  %v4348_v19 = vld [vmem:[%s5851_s1 + $0x48c] ss:$16 sps:$4 sm:$0xff]  }
  0x6f   :  { %1880 = vmatprep.mubr.bf16.mxu0 %v552_v21  ;;  %2332 = vmatprep.mubr.bf16.mxu1 %v552_v21  ;;  %v4355_v20 = vld [vmem:[%s5850_s0 + $0x15c] ss:$28 sps:$4 sm:$0xff]   ;;  %v4357_v21 = vld [vmem:[%s5850_s0 + $0x194] ss:$28 sps:$4 sm:$0xff]  }
  0x71   :  { %1924 = vmatpush1.bf16.msra.mxu0 %v4259_v24  ;;  %2376 = vmatpush1.bf16.msra.mxu1 %v4262_v25  ;;  %v4346_v24 = vld [vmem:[%s5851_s1 + $0x488] ss:$16 sps:$4 sm:$0xff]   ;;  %v4351_v25 = vld [vmem:[%s5851_s1 + $0x4a4] ss:$16 sps:$4 sm:$0xff]  }
  0x72   :  { %1925 = vmatprep.subr.bf16.mxu0 %v4273_v26  ;;  %2377 = vmatprep.subr.bf16.mxu1 %v4276_v27  ;;  %v4354_v26 = vld [vmem:[%s5851_s1 + $0x4ac] ss:$16 sps:$4 sm:$0xff]   ;;  %v533_v27 = vpack.c.bf16 %v4357_v21, %v4355_v20  ;;  %v4431_v21 = vld [vmem:[%s5850_s0 + $0x318] ss:$28 sps:$4 sm:$0xff]  }
  0x74   :  { %1881 = vmatmul.mubr.bf16.gmra.mrb[24].mxu0 %v551_v30  ;;  %2333 = vmatmul.mubr.bf16.gmra.mrb[24].mxu1 %v551_v30  ;;  %v4349_v30 = vld [vmem:[%s5851_s1 + $0x4a0] ss:$16 sps:$4 sm:$0xff]  }
  0x75   :  { %1926 = vmatpush1.bf16.msra.mxu0 %v4271_v31  ;;  %2378 = vmatpush1.bf16.msra.mxu1 %v4274_v32  ;;  %v4352_v31 = vld [vmem:[%s5851_s1 + $0x4a8] ss:$16 sps:$4 sm:$0xff]   ;;  %v4363_v32 = vld [vmem:[%s5851_s1 + $0x4c4] ss:$16 sps:$4 sm:$0xff]  }
  0x76   :  { %1927 = vmatprep.subr.bf16.mxu0 %v4279_v33  ;;  %2379 = vmatprep.subr.bf16.mxu1 %v4282_v34  ;;  %v4366_v33 = vld [vmem:[%s5851_s1 + $0x4cc] ss:$16 sps:$4 sm:$0xff]  }
  0x77   :  { %1890 = vmatprep.mubr.bf16.mxu0 %v559_v35  ;;  %2342 = vmatprep.mubr.bf16.mxu1 %v559_v35  ;;  %v4373_v34 = vld [vmem:[%s5850_s0 + $0x1cc] ss:$28 sps:$4 sm:$0xff]   ;;  %v4375_v35 = vld [vmem:[%s5850_s0 + $0x204] ss:$28 sps:$4 sm:$0xff]  }
  0x79   :  { %1928 = vmatpush1.bf16.msra.mxu0 %v4277_v38  ;;  %2380 = vmatpush1.bf16.msra.mxu1 %v4280_v39  ;;  %v4364_v38 = vld [vmem:[%s5851_s1 + $0x4c8] ss:$16 sps:$4 sm:$0xff]   ;;  %v4369_v39 = vld [vmem:[%s5851_s1 + $0x4e4] ss:$16 sps:$4 sm:$0xff]  }
  0x7a   :  { %1929 = vmatprep.subr.bf16.mxu0 %v4291_v40  ;;  %2381 = vmatprep.subr.bf16.mxu1 %v4294_v41  ;;  %v4372_v40 = vld [vmem:[%s5851_s1 + $0x4ec] ss:$16 sps:$4 sm:$0xff]   ;;  %v540_v41 = vpack.c.bf16 %v4375_v35, %v4373_v34  ;;  %v4442_v34 = vld [vmem:[%s5851_s1 + $0x5e8] ss:$16 sps:$4 sm:$0xff]  }
  0x7b   :  { %v4445_v35 = vld [vmem:[%s5850_s0 + $0x10] ss:$28 sps:$4 sm:$0xff]  }
  0x7c   :  { %1891 = vmatmul.mubr.bf16.gmra.mrb[28].mxu0 %v558_v44  ;;  %2343 = vmatmul.mubr.bf16.gmra.mrb[28].mxu1 %v558_v44  ;;  %v4367_v44 = vld [vmem:[%s5851_s1 + $0x4e0] ss:$16 sps:$4 sm:$0xff]  }
  0x7d   :  { %1930 = vmatpush1.bf16.msra.mxu0 %v4289_v45  ;;  %2382 = vmatpush1.bf16.msra.mxu1 %v4292_v46  ;;  %v4370_v45 = vld [vmem:[%s5851_s1 + $0x4e8] ss:$16 sps:$4 sm:$0xff]   ;;  %v4381_v46 = vld [vmem:[%s5851_s1 + $0x504] ss:$16 sps:$4 sm:$0xff]  }
  0x7e   :  { %1931 = vmatprep.subr.bf16.mxu0 %v4297_v47  ;;  %2383 = vmatprep.subr.bf16.mxu1 %v4300_v48  ;;  %v4384_v47 = vld [vmem:[%s5851_s1 + $0x50c] ss:$16 sps:$4 sm:$0xff]  }
  0x7f   :  { %1933 = vmatprep.mubr.bf16.mxu0 %v512_v51  ;;  %2385 = vmatprep.mubr.bf16.mxu1 %v512_v51  ;;  %v4391_v48 = vld [vmem:[%s5850_s0 + $0x23c] ss:$28 sps:$4 sm:$0xff]   ;;  %v4379_v51 = vld [vmem:[%s5851_s1 + $0x500] ss:$16 sps:$4 sm:$0xff]  }
  0x81   :  { %1932 = vmatpush1.bf16.msra.mxu0 %v4295_v52  ;;  %2384 = vmatpush1.bf16.msra.mxu1 %v4298_v53  ;;  %v4382_v52 = vld [vmem:[%s5851_s1 + $0x508] ss:$16 sps:$4 sm:$0xff]   ;;  %v4387_v53 = vld [vmem:[%s5851_s1 + $0x524] ss:$16 sps:$4 sm:$0xff]  }
  0x82   :  { %2014 = vmatprep.subr.bf16.mxu0 %v4309_v54  ;;  %2466 = vmatprep.subr.bf16.mxu1 %v4312_v55  ;;  %v4390_v54 = vld [vmem:[%s5851_s1 + $0x52c] ss:$16 sps:$4 sm:$0xff]   ;;  %v547_v55 = vpack.c.bf16 %v4393_v49, %v4391_v48  ;;  %v4463_v48 = vld [vmem:[%s5850_s0 + $0xf4] ss:$28 sps:$4 sm:$0xff]  }
  0x83   :  { %v4465_v49 = vld [vmem:[%s5850_s0 + $0x12c] ss:$28 sps:$4 sm:$0xff]  }
  0x84   :  { %1934 = vmatmul.mubr.bf16.vlgmr.msra.gmra.mrb[0].mxu0 %v511_v58  ;;  %2386 = vmatmul.mubr.bf16.vlgmr.msra.gmra.mrb[0].mxu1 %v511_v58  ;;  %v4385_v58 = vld [vmem:[%s5851_s1 + $0x520] ss:$16 sps:$4 sm:$0xff]  }
  0x85   :  { %2015 = vmatpush1.bf16.msra.mxu0 %v4307_v59  ;;  %2467 = vmatpush1.bf16.msra.mxu1 %v4310_v60  ;;  %v4388_v59 = vld [vmem:[%s5851_s1 + $0x528] ss:$16 sps:$4 sm:$0xff]   ;;  %v4399_v60 = vld [vmem:[%s5851_s1 + $0x544] ss:$16 sps:$4 sm:$0xff]  }
  0x86   :  { %2016 = vmatprep.subr.bf16.mxu0 %v4315_v61  ;;  %2468 = vmatprep.subr.bf16.mxu1 %v4318_v62  ;;  %v4402_v61 = vld [vmem:[%s5851_s1 + $0x54c] ss:$16 sps:$4 sm:$0xff]  }
  0x87   :  { %1943 = vmatprep.mubr.bf16.mxu0 %v519_v63  ;;  %2395 = vmatprep.mubr.bf16.mxu1 %v519_v63  ;;  %v4409_v62 = vld [vmem:[%s5850_s0 + $0x2ac] ss:$28 sps:$4 sm:$0xff]   ;;  %v4411_v63 = vld [vmem:[%s5850_s0 + $0x2e4] ss:$28 sps:$4 sm:$0xff]  }
  0x89   :  { %2017 = vmatpush1.bf16.msra.mxu0 %v4313_v2  ;;  %2469 = vmatpush1.bf16.msra.mxu1 %v4316_v3  ;;  %v4400_v2 = vld [vmem:[%s5851_s1 + $0x548] ss:$16 sps:$4 sm:$0xff]   ;;  %v4405_v3 = vld [vmem:[%s5851_s1 + $0x564] ss:$16 sps:$4 sm:$0xff]  }
  0x8a   :  { %2018 = vmatprep.subr.bf16.mxu0 %v4327_v4  ;;  %2470 = vmatprep.subr.bf16.mxu1 %v4330_v5  ;;  %v4408_v4 = vld [vmem:[%s5851_s1 + $0x56c] ss:$16 sps:$4 sm:$0xff]   ;;  %v554_v5 = vpack.c.bf16 %v4411_v63, %v4409_v62  ;;  %v4515_v62 = vld [vmem:[%s5853_s3 + $0x40] sm:$0xff]  }
  0x8b   :  { %v4477_v63 = vld [vmem:[%s5850_s0 + $0x20c] ss:$28 sps:$4 sm:$0xff]  }
  0x8c   :  { %1944 = vmatmul.mubr.bf16.gmra.mrb[4].mxu0 %v518_v8  ;;  %2396 = vmatmul.mubr.bf16.gmra.mrb[4].mxu1 %v518_v8  ;;  %v4403_v8 = vld [vmem:[%s5851_s1 + $0x560] ss:$16 sps:$4 sm:$0xff]  }
  0x8d   :  { %2019 = vmatpush1.bf16.msra.mxu0 %v4325_v9  ;;  %2471 = vmatpush1.bf16.msra.mxu1 %v4328_v10  ;;  %v4406_v9 = vld [vmem:[%s5851_s1 + $0x568] ss:$16 sps:$4 sm:$0xff]   ;;  %v4417_v10 = vld [vmem:[%s5851_s1 + $0x584] ss:$16 sps:$4 sm:$0xff]  }
  0x8e   :  { %2020 = vmatprep.subr.bf16.mxu0 %v4333_v11  ;;  %2472 = vmatprep.subr.bf16.mxu1 %v4336_v12  ;;  %v4420_v11 = vld [vmem:[%s5851_s1 + $0x58c] ss:$16 sps:$4 sm:$0xff]  }
  0x8f   :  { %1953 = vmatprep.mubr.bf16.mxu0 %v526_v13  ;;  %2405 = vmatprep.mubr.bf16.mxu1 %v526_v13  ;;  %v4427_v12 = vld [vmem:[%s5850_s0 + $0x31c] ss:$28 sps:$4 sm:$0xff]   ;;  %v4429_v13 = vld [vmem:[%s5850_s0 + $0x354] ss:$28 sps:$4 sm:$0xff]  }
  0x90   :  { %v561_v20 = vpack.c.bf16 %v4429_v13, %v4427_v12 }
  0x91   :  { %2021 = vmatpush1.bf16.msra.mxu0 %v4331_v16  ;;  %2473 = vmatpush1.bf16.msra.mxu1 %v4334_v17  ;;  %v4418_v16 = vld [vmem:[%s5851_s1 + $0x588] ss:$16 sps:$4 sm:$0xff]   ;;  %v4423_v17 = vld [vmem:[%s5851_s1 + $0x5a4] ss:$16 sps:$4 sm:$0xff]  }
  0x92   :  { %2022 = vmatprep.subr.bf16.mxu0 %v4345_v18  ;;  %2474 = vmatprep.subr.bf16.mxu1 %v4348_v19  ;;  %v4426_v18 = vld [vmem:[%s5851_s1 + $0x5ac] ss:$16 sps:$4 sm:$0xff]   ;;  %v4421_v19 = vld [vmem:[%s5851_s1 + $0x5a0] ss:$16 sps:$4 sm:$0xff]  }
  0x94   :  { %1954 = vmatmul.mubr.bf16.gmra.mrb[8].mxu0 %v525_v22  ;;  %2406 = vmatmul.mubr.bf16.gmra.mrb[8].mxu1 %v525_v22  ;;  %v4432_v22 = vld [vmem:[%s5850_s0 + $0x350] ss:$28 sps:$4 sm:$0xff]  }
  0x95   :  { %2023 = vmatpush1.bf16.msra.mxu0 %v4343_v23  ;;  %2475 = vmatpush1.bf16.msra.mxu1 %v4346_v24  ;;  %v4424_v23 = vld [vmem:[%s5851_s1 + $0x5a8] ss:$16 sps:$4 sm:$0xff]   ;;  %v4435_v24 = vld [vmem:[%s5851_s1 + $0x5c4] ss:$16 sps:$4 sm:$0xff]   ;;  %v560_v28 = vpack.c.bf16 %v4432_v22, %v4431_v21 }
  0x96   :  { %2024 = vmatprep.subr.bf16.mxu0 %v4351_v25  ;;  %2476 = vmatprep.subr.bf16.mxu1 %v4354_v26  ;;  %v4438_v25 = vld [vmem:[%s5851_s1 + $0x5cc] ss:$16 sps:$4 sm:$0xff]   ;;  %v4447_v26 = vld [vmem:[%s5850_s0 + $0x14] ss:$28 sps:$4 sm:$0xff]  }
  0x97   :  { %1963 = vmatprep.mubr.bf16.mxu0 %v533_v27  ;;  %2415 = vmatprep.mubr.bf16.mxu1 %v533_v27  ;;  %v4450_v27 = vld [vmem:[%s5850_s0 + $0x4c] ss:$28 sps:$4 sm:$0xff]   ;;  %v4498_v21 = vld [vmem:[%s5850_s0 + $0x358] ss:$28 sps:$4 sm:$0xff]  }
  0x99   :  { %2025 = vmatpush1.bf16.msra.mxu0 %v4349_v30  ;;  %2477 = vmatpush1.bf16.msra.mxu1 %v4352_v31  ;;  %v4436_v30 = vld [vmem:[%s5851_s1 + $0x5c8] ss:$16 sps:$4 sm:$0xff]   ;;  %v4441_v31 = vld [vmem:[%s5851_s1 + $0x5e4] ss:$16 sps:$4 sm:$0xff]  }
  0x9a   :  { %2026 = vmatprep.subr.bf16.mxu0 %v4363_v32  ;;  %2478 = vmatprep.subr.bf16.mxu1 %v4366_v33  ;;  %v4444_v32 = vld [vmem:[%s5851_s1 + $0x5ec] ss:$16 sps:$4 sm:$0xff]   ;;  %v4439_v33 = vld [vmem:[%s5851_s1 + $0x5e0] ss:$16 sps:$4 sm:$0xff]  }
  0x9c   :  { %1964 = vmatmul.mubr.bf16.gmra.mrb[12].mxu0 %v532_v36  ;;  %2416 = vmatmul.mubr.bf16.gmra.mrb[12].mxu1 %v532_v36  ;;  %v4448_v36 = vld [vmem:[%s5850_s0 + $0x48] ss:$28 sps:$4 sm:$0xff]  }
  0x9d   :  { %2027 = vmatpush1.bf16.msra.mxu0 %v4361_v37  ;;  %2479 = vmatpush1.bf16.msra.mxu1 %v4364_v38  ;;  %v514_v37 = vpack.c.bf16 %v4450_v27, %v4447_v26  ;;  %v4453_v38 = vld [vmem:[%s5851_s1 + $0x604] ss:$16 sps:$4 sm:$0xff]   ;;  %v513_v42 = vpack.c.bf16 %v4448_v36, %v4445_v35 }
  0x9e   :  { %2028 = vmatprep.subr.bf16.mxu0 %v4369_v39  ;;  %2480 = vmatprep.subr.bf16.mxu1 %v4372_v40  ;;  %v4456_v39 = vld [vmem:[%s5851_s1 + $0x60c] ss:$16 sps:$4 sm:$0xff]   ;;  %v4457_v40 = vld [vmem:[%s5850_s0 + $0x84] ss:$28 sps:$4 sm:$0xff]   ;;  %v4522_v35 = vld [vmem:[%s5853_s3 + $0x10] sm:$0xff]  }
  0x9f   :  { %1973 = vmatprep.mubr.bf16.mxu0 %v540_v41  ;;  %2425 = vmatprep.mubr.bf16.mxu1 %v540_v41  ;;  %v4459_v41 = vld [vmem:[%s5850_s0 + $0xbc] ss:$28 sps:$4 sm:$0xff]   ;;  %v4516_v26 = vld [vmem:[%s5853_s3] sm:$0xff]   ;;  %v4523_v36 = vld [vmem:[%s5853_s3 + $0x90] sm:$0xff]  }
  0xa0   :  { %v4517_v27 = vld [vmem:[%s5853_s3 + $0x80] sm:$0xff]  }
  0xa1   :  { %2029 = vmatpush1.bf16.msra.mxu0 %v4367_v44  ;;  %2481 = vmatpush1.bf16.msra.mxu1 %v4370_v45  ;;  %v4454_v44 = vld [vmem:[%s5851_s1 + $0x608] ss:$16 sps:$4 sm:$0xff]   ;;  %v521_v45 = vpack.c.bf16 %v4459_v41, %v4457_v40 }
  0xa2   :  { %2030 = vmatprep.subr.bf16.mxu0 %v4381_v46  ;;  %2482 = vmatprep.subr.bf16.mxu1 %v4384_v47  ;;  %v4461_v46 = vld [vmem:[%s5850_s0 + $0x80] ss:$28 sps:$4 sm:$0xff]   ;;  %v4462_v47 = vld [vmem:[%s5850_s0 + $0xb8] ss:$28 sps:$4 sm:$0xff]  }
  0xa3   :  { %v4525_v40 = vld [vmem:[%s5853_s3 + $0x18] sm:$0xff]  }
  0xa4   :  { %1974 = vmatmul.mubr.bf16.gmra.mrb[16].mxu0 %v539_v50  ;;  %2426 = vmatmul.mubr.bf16.gmra.mrb[16].mxu1 %v539_v50  ;;  %v4604_v50 = vmov 0   ;;  %v4526_v41 = vld [vmem:[%s5853_s3 + $0x98] sm:$0xff]  }
  0xa5   :  { %2031 = vmatpush1.bf16.msra.mxu0 %v4379_v51  ;;  %2483 = vmatpush1.bf16.msra.mxu1 %v4382_v52  ;;  %v520_v51 = vpack.c.bf16 %v4462_v47, %v4461_v46  ;;  %v528_v52 = vpack.c.bf16 %v4465_v49, %v4463_v48  ;;  %v4530_v46 = vld [vmem:[%s5853_s3 + $0x68] sm:$0xff]   ;;  %v4506_v48 = vld [vmem:[%s5850_s0 + $0x1a0] ss:$28 sps:$4 sm:$0xff]  }
  0xa6   :  { %2032 = vmatprep.subr.bf16.mxu0 %v4387_v53  ;;  %2484 = vmatprep.subr.bf16.mxu1 %v4390_v54  ;;  %v4467_v53 = vld [vmem:[%s5850_s0 + $0xf0] ss:$28 sps:$4 sm:$0xff]   ;;  %v4468_v54 = vld [vmem:[%s5850_s0 + $0x128] ss:$28 sps:$4 sm:$0xff]  }
  0xa7   :  { %1983 = vmatprep.mubr.bf16.mxu0 %v547_v55  ;;  %2435 = vmatprep.mubr.bf16.mxu1 %v547_v55  ;;  %v4469_v55 = vld [vmem:[%s5850_s0 + $0x164] ss:$28 sps:$4 sm:$0xff]   ;;  %v527_v57 = vpack.c.bf16 %v4468_v54, %v4467_v53  ;;  %v4531_v49 = vld [vmem:[%s5853_s3 + $0x28] sm:$0xff]   ;;  %v4534_v54 = vld [vmem:[%s5853_s3 + $0x30] sm:$0xff]  }
  0xa8   :  { %v4505_v47 = vld [vmem:[%s5850_s0 + $0x168] ss:$28 sps:$4 sm:$0xff]  }
  0xa9   :  { %2033 = vmatpush1.bf16.msra.mxu0 %v4385_v58  ;;  %2485 = vmatpush1.bf16.msra.mxu1 %v4388_v59  ;;  %v535_v58 = vpack.c.bf16 %v4471_v56, %v4469_v55  ;;  %v4473_v59 = vld [vmem:[%s5850_s0 + $0x160] ss:$28 sps:$4 sm:$0xff]   ;;  %v536_v53 = vpack.c.bf16 %v4506_v48, %v4505_v47  ;;  %v4535_v55 = vld [vmem:[%s5853_s3 + $0xb0] sm:$0xff]  }
  0xaa   :  { %2034 = vmatprep.subr.bf16.mxu0 %v4399_v60  ;;  %2486 = vmatprep.subr.bf16.mxu1 %v4402_v61  ;;  %v4474_v60 = vld [vmem:[%s5850_s0 + $0x198] ss:$28 sps:$4 sm:$0xff]  }
  0xab   :  { %v4475_v61 = vld [vmem:[%s5850_s0 + $0x1d4] ss:$28 sps:$4 sm:$0xff]  }
  0xac   :  { %1984 = vmatmul.mubr.bf16.gmra.mrb[20].mxu0 %v546_v0  ;;  %2436 = vmatmul.mubr.bf16.gmra.mrb[20].mxu1 %v546_v0  ;;  %v534_v0 = vpack.c.bf16 %v4474_v60, %v4473_v59  ;;  %v4507_v56 = vld [vmem:[%s5850_s0 + $0x1d8] ss:$28 sps:$4 sm:$0xff]   ;;  %v4509_v59 = vld [vmem:[%s5850_s0 + $0x248] ss:$28 sps:$4 sm:$0xff]   ;;  %v4510_v60 = vld [vmem:[%s5850_s0 + $0x280] ss:$28 sps:$4 sm:$0xff]  }
  0xad   :  { %2035 = vmatpush1.bf16.msra.mxu0 %v4397_v1  ;;  %2487 = vmatpush1.bf16.msra.mxu1 %v4400_v2  ;;  %v542_v1 = vpack.c.bf16 %v4477_v63, %v4475_v61  ;;  %v4479_v2 = vld [vmem:[%s5850_s0 + $0x1d0] ss:$28 sps:$4 sm:$0xff]   ;;  %v550_v61 = vpack.c.bf16 %v4510_v60, %v4509_v59 }
  0xae   :  { %2036 = vmatprep.subr.bf16.mxu0 %v4405_v3  ;;  %2488 = vmatprep.subr.bf16.mxu1 %v4408_v4  ;;  %v4480_v3 = vld [vmem:[%s5850_s0 + $0x208] ss:$28 sps:$4 sm:$0xff]   ;;  %v4512_v63 = vld [vmem:[%s5850_s0 + $0x2f0] ss:$28 sps:$4 sm:$0xff]  }
  0xaf   :  { %1993 = vmatprep.mubr.bf16.mxu0 %v554_v5  ;;  %2445 = vmatprep.mubr.bf16.mxu1 %v554_v5  ;;  %v4481_v4 = vld [vmem:[%s5850_s0 + $0x244] ss:$28 sps:$4 sm:$0xff]   ;;  %v4483_v5 = vld [vmem:[%s5850_s0 + $0x27c] ss:$28 sps:$4 sm:$0xff]   ;;  %v541_v6 = vpack.c.bf16 %v4480_v3, %v4479_v2 }
  0xb0   :  { %v549_v7 = vpack.c.bf16 %v4483_v5, %v4481_v4  ;;  %v4514_v2 = vld [vmem:[%s5850_s0 + $0x360] ss:$28 sps:$4 sm:$0xff]  }
  0xb1   :  { %2037 = vmatpush1.bf16.msra.mxu0 %v4403_v8  ;;  %2489 = vmatpush1.bf16.msra.mxu1 %v4406_v9  ;;  %v4485_v8 = vld [vmem:[%s5850_s0 + $0x240] ss:$28 sps:$4 sm:$0xff]   ;;  %v4486_v9 = vld [vmem:[%s5850_s0 + $0x278] ss:$28 sps:$4 sm:$0xff]  }
  0xb2   :  { %2038 = vmatprep.subr.bf16.mxu0 %v4417_v10  ;;  %2490 = vmatprep.subr.bf16.mxu1 %v4420_v11  ;;  %v4487_v10 = vld [vmem:[%s5850_s0 + $0x2b4] ss:$28 sps:$4 sm:$0xff]   ;;  %v4489_v11 = vld [vmem:[%s5850_s0 + $0x2ec] ss:$28 sps:$4 sm:$0xff]   ;;  %v548_v12 = vpack.c.bf16 %v4486_v9, %v4485_v8  ;;  %v4537_v4 = vld [vmem:[%s5853_s3 + $0xb8] sm:$0xff]   ;;  %v763_v8 = vlaneseq }
  0xb3   :  { %v556_v13 = vpack.c.bf16 %v4489_v11, %v4487_v10  ;;  %v4536_v5 = vld [vmem:[%s5853_s3 + $0x78] sm:$0xff]  }
  0xb4   :  { %1994 = vmatmul.mubr.bf16.gmra.mrb[24].mxu0 %v553_v14  ;;  %2446 = vmatmul.mubr.bf16.gmra.mrb[24].mxu1 %v553_v14  ;;  %v4491_v14 = vld [vmem:[%s5850_s0 + $0x2b0] ss:$28 sps:$4 sm:$0xff]   ;;  %v764_v9 = vshrl.u32 %v763_v8, 7 }
  0xb5   :  { %2039 = vmatpush1.bf16.msra.mxu0 %v4415_v15  ;;  %2491 = vmatpush1.bf16.msra.mxu1 %v4418_v16  ;;  %v4492_v15 = vld [vmem:[%s5850_s0 + $0x2e8] ss:$28 sps:$4 sm:$0xff]  }
  0xb6   :  { %2040 = vmatprep.subr.bf16.mxu0 %v4423_v17  ;;  %2492 = vmatprep.subr.bf16.mxu1 %v4426_v18  ;;  %v4493_v16 = vld [vmem:[%s5850_s0 + $0x324] ss:$28 sps:$4 sm:$0xff]   ;;  %v4495_v17 = vld [vmem:[%s5850_s0 + $0x35c] ss:$28 sps:$4 sm:$0xff]   ;;  %v555_v18 = vpack.c.bf16 %v4492_v15, %v4491_v14  ;;  %v765_v10 = vsub.s32 0, %v764_v9  ;;  %v773_v11 = vsub.s32 2, %v764_v9 }
  0xb7   :  { %2003 = vmatprep.mubr.bf16.mxu0 %v561_v20  ;;  %2455 = vmatprep.mubr.bf16.mxu1 %v561_v20  ;;  %v4497_v20 = vld [vmem:[%s5850_s0 + $0x320] ss:$28 sps:$4 sm:$0xff]  }
  0xb8   :  { %v562_v22 = vpack.c.bf16 %v4498_v21, %v4497_v20 }
  0xb9   :  { %2041 = vmatpush1.bf16.msra.mxu0 %v4421_v19  ;;  %2493 = vmatpush1.bf16.msra.mxu1 %v4424_v23  ;;  %v563_v19 = vpack.c.bf16 %v4495_v17, %v4493_v16  ;;  %v4499_v23 = vld [vmem:[%s5850_s0 + $0x18] ss:$28 sps:$4 sm:$0xff]  }
  0xba   :  { %2042 = vmatprep.subr.bf16.mxu0 %v4435_v24  ;;  %2494 = vmatprep.subr.bf16.mxu1 %v4438_v25  ;;  %v4500_v24 = vld [vmem:[%s5850_s0 + $0x50] ss:$28 sps:$4 sm:$0xff]  }
  0xbb   :  { %v515_v25 = vpack.c.bf16 %v4500_v24, %v4499_v23 }
  0xbc   :  { %2004 = vmatmul.mubr.bf16.gmra.mrb[28].mxu0 %v560_v28  ;;  %2456 = vmatmul.mubr.bf16.gmra.mrb[28].mxu1 %v560_v28  ;;  %v4518_v28 = vld [vmem:[%s5853_s3 + $0x48] sm:$0xff]  }
  0xbd   :  { %2043 = vmatpush1.bf16.msra.mxu0 %v4433_v29  ;;  %2495 = vmatpush1.bf16.msra.mxu1 %v4436_v30  ;;  %v4501_v29 = vld [vmem:[%s5850_s0 + $0x88] ss:$28 sps:$4 sm:$0xff]   ;;  %v4502_v30 = vld [vmem:[%s5850_s0 + $0xc0] ss:$28 sps:$4 sm:$0xff]  }
  0xbe   :  { %2044 = vmatprep.subr.bf16.mxu0 %v4441_v31  ;;  %2496 = vmatprep.subr.bf16.mxu1 %v4444_v32  ;;  %v4519_v31 = vld [vmem:[%s5853_s3 + $0x8] sm:$0xff]  }
  0xbf   :  { %2046 = vmatprep.mubr.bf16.mxu0 %v514_v37  ;;  %2498 = vmatprep.mubr.bf16.mxu1 %v514_v37  ;;  %v4520_v32 = vld [vmem:[%s5853_s3 + $0x88] sm:$0xff]   ;;  %v4524_v37 = vld [vmem:[%s5853_s3 + $0x58] sm:$0xff]  }
  0xc1   :  { %2045 = vmatpush1.bf16.msra.mxu0 %v4439_v33  ;;  %2497 = vmatpush1.bf16.msra.mxu1 %v4442_v34  ;;  %v4521_v33 = vld [vmem:[%s5853_s3 + $0x50] sm:$0xff]   ;;  %v522_v34 = vpack.c.bf16 %v4502_v30, %v4501_v29 }
  0xc2   :  { %2127 = vmatprep.subr.bf16.mxu0 %v4453_v38  ;;  %2579 = vmatprep.subr.bf16.mxu1 %v4456_v39  ;;  %v4503_v38 = vld [vmem:[%s5850_s0 + $0xf8] ss:$28 sps:$4 sm:$0xff]   ;;  %v4504_v39 = vld [vmem:[%s5850_s0 + $0x130] ss:$28 sps:$4 sm:$0xff]  }
  0xc4   :  { %2047 = vmatmul.mubr.bf16.vlgmr.msra.gmra.mrb[0].mxu0 %v513_v42  ;;  %2499 = vmatmul.mubr.bf16.vlgmr.msra.gmra.mrb[0].mxu1 %v513_v42  ;;  %v4527_v42 = vld [vmem:[%s5853_s3 + $0x60] sm:$0xff]  }
  0xc5   :  { %2128 = vmatpush1.bf16.msra.mxu0 %v4451_v43  ;;  %2580 = vmatpush1.bf16.msra.mxu1 %v4454_v44  ;;  %v529_v43 = vpack.c.bf16 %v4504_v39, %v4503_v38  ;;  %v4528_v44 = vld [vmem:[%s5853_s3 + $0x20] sm:$0xff]  }
  0xc6   :  { %2056 = vmatprep.mubr.bf16.mxu0 %v521_v45  ;;  %2508 = vmatprep.mubr.bf16.mxu1 %v521_v45  ;;  %v4529_v45 = vld [vmem:[%s5853_s3 + $0xa0] sm:$0xff]  }
  0xc7   :  { %3116 = vmatprep.subr.bf16.mxu1 %v4604_v50  ;;  %3740 = vmatprep.subr.bf16.mxu0 %v4515_v62  ;;  %v4511_v62 = vld [vmem:[%s5850_s0 + $0x2b8] ss:$28 sps:$4 sm:$0xff]  }
  0xcc   :  { %2057 = vmatmul.mubr.bf16.gmra.mrb[4].mxu0 %v520_v51  ;;  %2509 = vmatmul.mubr.bf16.gmra.mrb[4].mxu1 %v520_v51  ;;  %v4532_v51 = vld [vmem:[%s5853_s3 + $0xa8] sm:$0xff]  }
  0xcd   :  { %2066 = vmatprep.mubr.bf16.mxu0 %v528_v52  ;;  %2518 = vmatprep.mubr.bf16.mxu1 %v528_v52  ;;  %v4533_v52 = vld [vmem:[%s5853_s3 + $0x70] sm:$0xff]  }
  0xd4   :  { %2067 = vmatmul.mubr.bf16.gmra.mrb[8].mxu0 %v527_v57  ;;  %2519 = vmatmul.mubr.bf16.gmra.mrb[8].mxu1 %v527_v57  ;;  %v4508_v57 = vld [vmem:[%s5850_s0 + $0x210] ss:$28 sps:$4 sm:$0xff]  }
  0xd5   :  { %2076 = vmatprep.mubr.bf16.mxu0 %v535_v58  ;;  %2528 = vmatprep.mubr.bf16.mxu1 %v535_v58  ;;  %v543_v58 = vpack.c.bf16 %v4508_v57, %v4507_v56 }
  0xdc   :  { %2077 = vmatmul.mubr.bf16.gmra.mrb[12].mxu0 %v534_v0  ;;  %2529 = vmatmul.mubr.bf16.gmra.mrb[12].mxu1 %v534_v0  ;;  %v557_v0 = vpack.c.bf16 %v4512_v63, %v4511_v62 }
  0xdd   :  { %2086 = vmatprep.mubr.bf16.mxu0 %v542_v1  ;;  %2538 = vmatprep.mubr.bf16.mxu1 %v542_v1  ;;  %v4513_v1 = vld [vmem:[%s5850_s0 + $0x328] ss:$28 sps:$4 sm:$0xff]  }
  0xde   :  { %v564_v3 = vpack.c.bf16 %v4514_v2, %v4513_v1 }
  0xe4   :  { %2087 = vmatmul.mubr.bf16.gmra.mrb[16].mxu0 %v541_v6  ;;  %2539 = vmatmul.mubr.bf16.gmra.mrb[16].mxu1 %v541_v6  ;;  %v4538_v6 = vld [vmem:[%s5853_s3 + $0x38] sm:$0xff]  }
  0xe5   :  { %2096 = vmatprep.mubr.bf16.mxu0 %v549_v7  ;;  %2548 = vmatprep.mubr.bf16.mxu1 %v549_v7  ;;  %v4539_v7 = vld [vmem:[%s5853_s3 + $0xc0] sm:$0xff]  }
  0xec   :  { %2097 = vmatmul.mubr.bf16.gmra.mrb[20].mxu0 %v548_v12  ;;  %2549 = vmatmul.mubr.bf16.gmra.mrb[20].mxu1 %v548_v12  ;;  %v761_v12 = vld [vmem:[%s5852_s2] sm:$0xf] }
  0xed   :  { %2106 = vmatprep.mubr.bf16.mxu0 %v556_v13  ;;  %2558 = vmatprep.mubr.bf16.mxu1 %v556_v13  ;;  %v777_v13 = vsub.s32 3, %v764_v9  ;;  %v5691_v14 = vrot.slane %v761_v12, %v765_v10  ;;  %v5693_v15 = vrot.slane %v761_v12, %v773_v11 }
  0xef   :  { %v5697_v17 = vrot.slane %v761_v12, %v777_v13 }
  0xf4   :  { %2107 = vmatmul.mubr.bf16.gmra.mrb[24].mxu0 %v555_v18  ;;  %2559 = vmatmul.mubr.bf16.gmra.mrb[24].mxu1 %v555_v18 }
  0xf5   :  { %2116 = vmatprep.mubr.bf16.mxu0 %v563_v19  ;;  %2568 = vmatprep.mubr.bf16.mxu1 %v563_v19 }
  0xfc   :  { %2117 = vmatmul.mubr.bf16.gmra.mrb[28].mxu0 %v562_v22  ;;  %2569 = vmatmul.mubr.bf16.gmra.mrb[28].mxu1 %v562_v22 }
  0xfd   :  { %2159 = vmatprep.mubr.bf16.mxu0 %v4604_v50  ;;  %2611 = vmatprep.mubr.bf16.mxu1 %v4604_v50 }
 0x104   :  { %3672 = vmatmul.mubr.msk.bf16.vlgmr.msra.gmra.mrb[0].mxu0 %vm1763_vm0, %v515_v25  ;;  %3680 = vmatmul.mubr.msk.bf16.vlgmr.msra.gmra.mrb[0].mxu1 %vm1763_vm0, %v515_v25 }
 0x105   :  { %2169 = vmatprep.mubr.bf16.mxu0 %v4604_v50  ;;  %2621 = vmatprep.mubr.bf16.mxu1 %v4604_v50 }
 0x106   :  { %3741 = vmatpush3.bf16.msra.mxu0 %v4516_v26  ;;  %3117 = vmatpush1.bf16.msra.mxu1 %v4517_v27 }
 0x107   :  { %3742 = vmatprep.subr.bf16.mxu0 %v4518_v28  ;;  %3118 = vmatprep.subr.bf16.mxu1 %v4604_v50 }
 0x10a   :  { %3743 = vmatpush3.bf16.msra.mxu0 %v4519_v31  ;;  %3119 = vmatpush1.bf16.msra.mxu1 %v4520_v32 }
 0x10b   :  { %3744 = vmatprep.subr.bf16.mxu0 %v4521_v33  ;;  %3120 = vmatprep.subr.bf16.mxu1 %v4604_v50 }
 0x10c   :  { %3673 = vmatmul.mubr.msk.bf16.gmra.mrb[4].mxu0 %vm1763_vm0, %v522_v34  ;;  %3681 = vmatmul.mubr.msk.bf16.gmra.mrb[4].mxu1 %vm1763_vm0, %v522_v34 }
 0x10d   :  { %2179 = vmatprep.mubr.bf16.mxu0 %v4604_v50  ;;  %2631 = vmatprep.mubr.bf16.mxu1 %v4604_v50 }
 0x10e   :  { %3745 = vmatpush3.bf16.msra.mxu0 %v4522_v35  ;;  %3121 = vmatpush1.bf16.msra.mxu1 %v4523_v36 }
 0x10f   :  { %3746 = vmatprep.subr.bf16.mxu0 %v4524_v37  ;;  %3122 = vmatprep.subr.bf16.mxu1 %v4604_v50 }
 0x112   :  { %3747 = vmatpush3.bf16.msra.mxu0 %v4525_v40  ;;  %3123 = vmatpush1.bf16.msra.mxu1 %v4526_v41 }
 0x113   :  { %3748 = vmatprep.subr.bf16.mxu0 %v4527_v42  ;;  %3124 = vmatprep.subr.bf16.mxu1 %v4604_v50 }
 0x114   :  { %3674 = vmatmul.mubr.msk.bf16.gmra.mrb[8].mxu0 %vm1763_vm0, %v529_v43  ;;  %3682 = vmatmul.mubr.msk.bf16.gmra.mrb[8].mxu1 %vm1763_vm0, %v529_v43 }
 0x115   :  { %2189 = vmatprep.mubr.bf16.mxu0 %v4604_v50  ;;  %2641 = vmatprep.mubr.bf16.mxu1 %v4604_v50 }
 0x116   :  { %3749 = vmatpush3.bf16.msra.mxu0 %v4528_v44  ;;  %3125 = vmatpush1.bf16.msra.mxu1 %v4529_v45 }
 0x117   :  { %3750 = vmatprep.subr.bf16.mxu0 %v4530_v46  ;;  %3126 = vmatprep.subr.bf16.mxu1 %v4604_v50 }
 0x11a   :  { %3751 = vmatpush3.bf16.msra.mxu0 %v4531_v49  ;;  %3127 = vmatpush1.bf16.msra.mxu1 %v4532_v51 }
 0x11b   :  { %3752 = vmatprep.subr.bf16.mxu0 %v4533_v52  ;;  %3128 = vmatprep.subr.bf16.mxu1 %v4604_v50 }
 0x11c   :  { %3675 = vmatmul.mubr.msk.bf16.gmra.mrb[12].mxu0 %vm1763_vm0, %v536_v53  ;;  %3683 = vmatmul.mubr.msk.bf16.gmra.mrb[12].mxu1 %vm1763_vm0, %v536_v53 }
 0x11d   :  { %2199 = vmatprep.mubr.bf16.mxu0 %v4604_v50  ;;  %2651 = vmatprep.mubr.bf16.mxu1 %v4604_v50 }
 0x11e   :  { %3753 = vmatpush3.bf16.msra.mxu0 %v4534_v54  ;;  %3129 = vmatpush1.bf16.msra.mxu1 %v4535_v55 }
 0x11f   :  { %3130 = vmatprep.subr.bf16.mxu1 %v4604_v50  ;;  %3754 = vmatprep.subr.bf16.mxu0 %v4536_v5 }
 0x122   :  { %3131 = vmatpush1.bf16.msra.mxu1 %v4537_v4  ;;  %3755 = vmatpush3.bf16.msra.mxu0 %v4538_v6 }
 0x123   :  { %3132 = vmatprep.subr.bf16.mxu1 %v4604_v50 }
 0x124   :  { %3676 = vmatmul.mubr.msk.bf16.gmra.mrb[16].mxu0 %vm1763_vm0, %v543_v58  ;;  %3684 = vmatmul.mubr.msk.bf16.gmra.mrb[16].mxu1 %vm1763_vm0, %v543_v58 }
 0x125   :  { %2209 = vmatprep.mubr.bf16.mxu0 %v4604_v50  ;;  %2661 = vmatprep.mubr.bf16.mxu1 %v4604_v50 }
 0x126   :  { %3133 = vmatpush1.bf16.msra.mxu1 %v4539_v7 }
 0x12c   :  { %3677 = vmatmul.mubr.msk.bf16.gmra.mrb[20].mxu0 %vm1763_vm0, %v550_v61  ;;  %3685 = vmatmul.mubr.msk.bf16.gmra.mrb[20].mxu1 %vm1763_vm0, %v550_v61 }
 0x12d   :  { %2219 = vmatprep.mubr.bf16.mxu0 %v4604_v50  ;;  %2671 = vmatprep.mubr.bf16.mxu1 %v4604_v50 }
 0x134   :  { %3678 = vmatmul.mubr.msk.bf16.gmra.mrb[24].mxu0 %vm1763_vm0, %v557_v0  ;;  %3686 = vmatmul.mubr.msk.bf16.gmra.mrb[24].mxu1 %vm1763_vm0, %v557_v0 }
 0x135   :  { %2229 = vmatprep.mubr.bf16.mxu0 %v4604_v50  ;;  %2681 = vmatprep.mubr.bf16.mxu1 %v4604_v50  ;;  %v769_v50 = vsub.s32 1, %v764_v9 }
 0x137   :  { %v5695_v16 = vrot.slane %v761_v12, %v769_v50 }
 0x13c   :  { %3679 = vmatmul.mubr.msk.bf16.gmra.mrb[28].mxu0 %vm1763_vm0, %v564_v3  ;;  %3687 = vmatmul.mubr.msk.bf16.gmra.mrb[28].mxu1 %vm1763_vm0, %v564_v3 }
 0x1d7   :  { %v2161_v18 = vpop.f32.mrb[0].mxu0  ;;  %v2613_v19 = vpop.f32.mrb[0].mxu1 }
 0x1d8   :  { %v3804_v20 = vadd.f32 %v2161_v18, %v5691_v14  ;;  %v3836_v21 = vadd.f32 %v2613_v19, %v5693_v15  ;;  %v2163_v22 = vpop.f32.mrb[1].mxu0  ;;  %v2615_v23 = vpop.f32.mrb[1].mxu1 }
 0x1d9   :  { %v3805_v24 = vadd.f32 %v2163_v22, %v5695_v16  ;;  %v3837_v25 = vadd.f32 %v2615_v23, %v5697_v17  ;;  %v2165_v26 = vpop.f32.mrb[2].mxu0  ;;  %v2617_v27 = vpop.f32.mrb[2].mxu1 }
 0x1da   :  { %v3806_v28 = vadd.f32 %v2165_v26, %v5691_v14  ;;  %v3838_v29 = vadd.f32 %v2617_v27, %v5693_v15  ;;  %v2167_v30 = vpop.f32.mrb[3].mxu0  ;;  %v2619_v31 = vpop.f32.mrb[3].mxu1  ;;  %v2692_v34 = vmax.f32 %v3804_v20, 0.0  ;;  %v2694_v35 = vmax.f32 %v3836_v21, 0.0 }
 0x1db   :  { %v3807_v32 = vadd.f32 %v2167_v30, %v5695_v16  ;;  %v3839_v33 = vadd.f32 %v2619_v31, %v5697_v17  ;;  %v2693_v38 = vmax.f32 %v3805_v24, 0.0  ;;  %v2695_v39 = vmax.f32 %v3837_v25, 0.0 }
 0x1dc   :  { %v2696_v36 = vmax.f32 %v3806_v28, 0.0  ;;  %v2698_v37 = vmax.f32 %v3838_v29, 0.0 }
 0x1dd   :  { %v2697_v40 = vmax.f32 %v3807_v32, 0.0  ;;  %v2699_v41 = vmax.f32 %v3839_v33, 0.0 }
 0x1de   :  { %v2756_v42 = vpack.c.bf16 %v2696_v36, %v2692_v34  ;;  %v2758_v43 = vpack.c.bf16 %v2698_v37, %v2694_v35 }
 0x1df   :  { %v2757_v44 = vpack.c.bf16 %v2697_v40, %v2693_v38  ;;  %v2759_v45 = vpack.c.bf16 %v2699_v41, %v2695_v39  ;;  %v2171_v46 = vpop.f32.mrb[4].mxu0  ;;  %v2623_v47 = vpop.f32.mrb[4].mxu1 }
 0x1e0   :  { %v3808_v48 = vadd.f32 %v2171_v46, %v5691_v14  ;;  %v3840_v49 = vadd.f32 %v2623_v47, %v5693_v15  ;;  %v2173_v51 = vpop.f32.mrb[5].mxu0  ;;  %v2625_v52 = vpop.f32.mrb[5].mxu1 }
 0x1e1   :  { %v3809_v53 = vadd.f32 %v2173_v51, %v5695_v16  ;;  %v3841_v54 = vadd.f32 %v2625_v52, %v5697_v17  ;;  %v2175_v55 = vpop.f32.mrb[6].mxu0  ;;  %v2627_v56 = vpop.f32.mrb[6].mxu1  ;;  %3051 = vmatprep.mubr.bf16.mxu0 %v2757_v44  ;;  %3714 = vmatprep.mubr.msk.bf16.mxu1 %vm1763_vm0, %v2759_v45 }
 0x1e2   :  { %v3810_v57 = vadd.f32 %v2175_v55, %v5691_v14  ;;  %v3842_v58 = vadd.f32 %v2627_v56, %v5693_v15  ;;  %v2177_v59 = vpop.f32.mrb[7].mxu0  ;;  %v2629_v60 = vpop.f32.mrb[7].mxu1  ;;  %3052 = vmatmul.mubr.bf16.vlgmr.msra.gmra.mrb[32].mxu0 %v2756_v42  ;;  %3149 = vmatmul.mubr.bf16.vlgmr.msra.gmra.mrb[32].mxu1 %v2758_v43  ;;  %v2700_v63 = vmax.f32 %v3808_v48, 0.0  ;;  %v2702_v0 = vmax.f32 %v3840_v49, 0.0 }
 0x1e3   :  { %v3811_v61 = vadd.f32 %v2177_v59, %v5695_v16  ;;  %v3843_v62 = vadd.f32 %v2629_v60, %v5697_v17  ;;  %v2701_v3 = vmax.f32 %v3809_v53, 0.0  ;;  %v2703_v4 = vmax.f32 %v3841_v54, 0.0 }
 0x1e4   :  { %v2704_v1 = vmax.f32 %v3810_v57, 0.0  ;;  %v2706_v2 = vmax.f32 %v3842_v58, 0.0 }
 0x1e5   :  { %v2705_v5 = vmax.f32 %v3811_v61, 0.0  ;;  %v2707_v6 = vmax.f32 %v3843_v62, 0.0 }
 0x1e6   :  { %v2760_v7 = vpack.c.bf16 %v2704_v1, %v2700_v63  ;;  %v2762_v8 = vpack.c.bf16 %v2706_v2, %v2702_v0 }
 0x1e7   :  { %v2761_v9 = vpack.c.bf16 %v2705_v5, %v2701_v3  ;;  %v2763_v10 = vpack.c.bf16 %v2707_v6, %v2703_v4  ;;  %v2181_v11 = vpop.f32.mrb[8].mxu0  ;;  %v2633_v12 = vpop.f32.mrb[8].mxu1 }
 0x1e8   :  { %v3812_v50 = vadd.f32 %v2181_v11, %v5691_v14  ;;  %v3844_v13 = vadd.f32 %v2633_v12, %v5693_v15  ;;  %v2183_v18 = vpop.f32.mrb[9].mxu0  ;;  %v2635_v19 = vpop.f32.mrb[9].mxu1 }
 0x1e9   :  { %v3813_v20 = vadd.f32 %v2183_v18, %v5695_v16  ;;  %v3845_v21 = vadd.f32 %v2635_v19, %v5697_v17  ;;  %v2185_v22 = vpop.f32.mrb[10].mxu0  ;;  %v2637_v23 = vpop.f32.mrb[10].mxu1  ;;  %3059 = vmatprep.mubr.bf16.mxu0 %v2761_v9  ;;  %3715 = vmatprep.mubr.msk.bf16.mxu1 %vm1763_vm0, %v2763_v10 }
 0x1ea   :  { %v3814_v24 = vadd.f32 %v2185_v22, %v5691_v14  ;;  %v3846_v25 = vadd.f32 %v2637_v23, %v5693_v15  ;;  %v2187_v26 = vpop.f32.mrb[11].mxu0  ;;  %v2639_v27 = vpop.f32.mrb[11].mxu1  ;;  %3060 = vmatmul.mubr.bf16.gmra.mrb[36].mxu0 %v2760_v7  ;;  %3157 = vmatmul.mubr.bf16.gmra.mrb[36].mxu1 %v2762_v8  ;;  %v2708_v30 = vmax.f32 %v3812_v50, 0.0  ;;  %v2710_v31 = vmax.f32 %v3844_v13, 0.0 }
 0x1eb   :  { %v3815_v28 = vadd.f32 %v2187_v26, %v5695_v16  ;;  %v3847_v29 = vadd.f32 %v2639_v27, %v5697_v17  ;;  %v2709_v34 = vmax.f32 %v3813_v20, 0.0  ;;  %v2711_v35 = vmax.f32 %v3845_v21, 0.0 }
 0x1ec   :  { %v2712_v32 = vmax.f32 %v3814_v24, 0.0  ;;  %v2714_v33 = vmax.f32 %v3846_v25, 0.0 }
 0x1ed   :  { %v2713_v36 = vmax.f32 %v3815_v28, 0.0  ;;  %v2715_v37 = vmax.f32 %v3847_v29, 0.0 }
 0x1ee   :  { %v2764_v38 = vpack.c.bf16 %v2712_v32, %v2708_v30  ;;  %v2766_v39 = vpack.c.bf16 %v2714_v33, %v2710_v31 }
 0x1ef   :  { %v2765_v40 = vpack.c.bf16 %v2713_v36, %v2709_v34  ;;  %v2767_v41 = vpack.c.bf16 %v2715_v37, %v2711_v35  ;;  %v2191_v42 = vpop.f32.mrb[12].mxu0  ;;  %v2643_v43 = vpop.f32.mrb[12].mxu1 }
 0x1f0   :  { %v3816_v44 = vadd.f32 %v2191_v42, %v5691_v14  ;;  %v3848_v45 = vadd.f32 %v2643_v43, %v5693_v15  ;;  %v2193_v46 = vpop.f32.mrb[13].mxu0  ;;  %v2645_v47 = vpop.f32.mrb[13].mxu1 }
 0x1f1   :  { %v3817_v48 = vadd.f32 %v2193_v46, %v5695_v16  ;;  %v3849_v49 = vadd.f32 %v2645_v47, %v5697_v17  ;;  %v2195_v51 = vpop.f32.mrb[14].mxu0  ;;  %v2647_v52 = vpop.f32.mrb[14].mxu1  ;;  %3067 = vmatprep.mubr.bf16.mxu0 %v2765_v40  ;;  %3716 = vmatprep.mubr.msk.bf16.mxu1 %vm1763_vm0, %v2767_v41 }
 0x1f2   :  { %v3818_v53 = vadd.f32 %v2195_v51, %v5691_v14  ;;  %v3850_v54 = vadd.f32 %v2647_v52, %v5693_v15  ;;  %v2197_v55 = vpop.f32.mrb[15].mxu0  ;;  %v2649_v56 = vpop.f32.mrb[15].mxu1  ;;  %3068 = vmatmul.mubr.bf16.gmra.mrb[40].mxu0 %v2764_v38  ;;  %3165 = vmatmul.mubr.bf16.gmra.mrb[40].mxu1 %v2766_v39  ;;  %v2716_v59 = vmax.f32 %v3816_v44, 0.0  ;;  %v2718_v60 = vmax.f32 %v3848_v45, 0.0 }
 0x1f3   :  { %v3819_v57 = vadd.f32 %v2197_v55, %v5695_v16  ;;  %v3851_v58 = vadd.f32 %v2649_v56, %v5697_v17  ;;  %v2717_v63 = vmax.f32 %v3817_v48, 0.0  ;;  %v2719_v0 = vmax.f32 %v3849_v49, 0.0 }
 0x1f4   :  { %v2720_v61 = vmax.f32 %v3818_v53, 0.0  ;;  %v2722_v62 = vmax.f32 %v3850_v54, 0.0 }
 0x1f5   :  { %v2721_v1 = vmax.f32 %v3819_v57, 0.0  ;;  %v2723_v2 = vmax.f32 %v3851_v58, 0.0 }
 0x1f6   :  { %v2768_v3 = vpack.c.bf16 %v2720_v61, %v2716_v59  ;;  %v2770_v4 = vpack.c.bf16 %v2722_v62, %v2718_v60 }
 0x1f7   :  { %v2769_v5 = vpack.c.bf16 %v2721_v1, %v2717_v63  ;;  %v2771_v6 = vpack.c.bf16 %v2723_v2, %v2719_v0  ;;  %v2201_v7 = vpop.f32.mrb[16].mxu0  ;;  %v2653_v8 = vpop.f32.mrb[16].mxu1 }
 0x1f8   :  { %v3820_v9 = vadd.f32 %v2201_v7, %v5691_v14  ;;  %v3852_v10 = vadd.f32 %v2653_v8, %v5693_v15  ;;  %v2203_v11 = vpop.f32.mrb[17].mxu0  ;;  %v2655_v12 = vpop.f32.mrb[17].mxu1 }
 0x1f9   :  { %v3821_v50 = vadd.f32 %v2203_v11, %v5695_v16  ;;  %v3853_v13 = vadd.f32 %v2655_v12, %v5697_v17  ;;  %v2205_v18 = vpop.f32.mrb[18].mxu0  ;;  %v2657_v19 = vpop.f32.mrb[18].mxu1  ;;  %3075 = vmatprep.mubr.bf16.mxu0 %v2769_v5  ;;  %3717 = vmatprep.mubr.msk.bf16.mxu1 %vm1763_vm0, %v2771_v6 }
 0x1fa   :  { %v3822_v20 = vadd.f32 %v2205_v18, %v5691_v14  ;;  %v3854_v21 = vadd.f32 %v2657_v19, %v5693_v15  ;;  %v2207_v22 = vpop.f32.mrb[19].mxu0  ;;  %v2659_v23 = vpop.f32.mrb[19].mxu1  ;;  %3076 = vmatmul.mubr.bf16.gmra.mrb[44].mxu0 %v2768_v3  ;;  %3173 = vmatmul.mubr.bf16.gmra.mrb[44].mxu1 %v2770_v4  ;;  %v2724_v26 = vmax.f32 %v3820_v9, 0.0  ;;  %v2726_v27 = vmax.f32 %v3852_v10, 0.0 }
 0x1fb   :  { %v3823_v24 = vadd.f32 %v2207_v22, %v5695_v16  ;;  %v3855_v25 = vadd.f32 %v2659_v23, %v5697_v17  ;;  %v2725_v30 = vmax.f32 %v3821_v50, 0.0  ;;  %v2727_v31 = vmax.f32 %v3853_v13, 0.0 }
 0x1fc   :  { %v2728_v28 = vmax.f32 %v3822_v20, 0.0  ;;  %v2730_v29 = vmax.f32 %v3854_v21, 0.0 }
 0x1fd   :  { %v2729_v32 = vmax.f32 %v3823_v24, 0.0  ;;  %v2731_v33 = vmax.f32 %v3855_v25, 0.0 }
 0x1fe   :  { %v2772_v34 = vpack.c.bf16 %v2728_v28, %v2724_v26  ;;  %v2774_v35 = vpack.c.bf16 %v2730_v29, %v2726_v27 }
 0x1ff   :  { %v2773_v36 = vpack.c.bf16 %v2729_v32, %v2725_v30  ;;  %v2775_v37 = vpack.c.bf16 %v2731_v33, %v2727_v31  ;;  %v2211_v38 = vpop.f32.mrb[20].mxu0  ;;  %v2663_v39 = vpop.f32.mrb[20].mxu1 }
 0x200   :  { %v3824_v40 = vadd.f32 %v2211_v38, %v5691_v14  ;;  %v3856_v41 = vadd.f32 %v2663_v39, %v5693_v15  ;;  %v2213_v42 = vpop.f32.mrb[21].mxu0  ;;  %v2665_v43 = vpop.f32.mrb[21].mxu1 }
 0x201   :  { %v3825_v44 = vadd.f32 %v2213_v42, %v5695_v16  ;;  %v3857_v45 = vadd.f32 %v2665_v43, %v5697_v17  ;;  %v2215_v46 = vpop.f32.mrb[22].mxu0  ;;  %v2667_v47 = vpop.f32.mrb[22].mxu1  ;;  %3083 = vmatprep.mubr.bf16.mxu0 %v2773_v36  ;;  %3718 = vmatprep.mubr.msk.bf16.mxu1 %vm1763_vm0, %v2775_v37 }
 0x202   :  { %v3826_v48 = vadd.f32 %v2215_v46, %v5691_v14  ;;  %v3858_v49 = vadd.f32 %v2667_v47, %v5693_v15  ;;  %v2217_v51 = vpop.f32.mrb[23].mxu0  ;;  %v2669_v52 = vpop.f32.mrb[23].mxu1  ;;  %3084 = vmatmul.mubr.bf16.gmra.mrb[48].mxu0 %v2772_v34  ;;  %3181 = vmatmul.mubr.bf16.gmra.mrb[48].mxu1 %v2774_v35  ;;  %v2732_v55 = vmax.f32 %v3824_v40, 0.0  ;;  %v2734_v56 = vmax.f32 %v3856_v41, 0.0 }
 0x203   :  { %v3827_v53 = vadd.f32 %v2217_v51, %v5695_v16  ;;  %v3859_v54 = vadd.f32 %v2669_v52, %v5697_v17  ;;  %v2733_v59 = vmax.f32 %v3825_v44, 0.0  ;;  %v2735_v60 = vmax.f32 %v3857_v45, 0.0 }
 0x204   :  { %v2736_v57 = vmax.f32 %v3826_v48, 0.0  ;;  %v2738_v58 = vmax.f32 %v3858_v49, 0.0 }
 0x205   :  { %v2737_v61 = vmax.f32 %v3827_v53, 0.0  ;;  %v2739_v62 = vmax.f32 %v3859_v54, 0.0 }
 0x206   :  { %v2776_v63 = vpack.c.bf16 %v2736_v57, %v2732_v55  ;;  %v2778_v0 = vpack.c.bf16 %v2738_v58, %v2734_v56 }
 0x207   :  { %v2777_v1 = vpack.c.bf16 %v2737_v61, %v2733_v59  ;;  %v2779_v2 = vpack.c.bf16 %v2739_v62, %v2735_v60  ;;  %v2221_v3 = vpop.f32.mrb[24].mxu0  ;;  %v2673_v4 = vpop.f32.mrb[24].mxu1 }
 0x208   :  { %v3828_v5 = vadd.f32 %v2221_v3, %v5691_v14  ;;  %v3860_v6 = vadd.f32 %v2673_v4, %v5693_v15  ;;  %v2223_v7 = vpop.f32.mrb[25].mxu0  ;;  %v2675_v8 = vpop.f32.mrb[25].mxu1 }
 0x209   :  { %v3829_v9 = vadd.f32 %v2223_v7, %v5695_v16  ;;  %v3861_v10 = vadd.f32 %v2675_v8, %v5697_v17  ;;  %v2225_v11 = vpop.f32.mrb[26].mxu0  ;;  %v2677_v12 = vpop.f32.mrb[26].mxu1  ;;  %3091 = vmatprep.mubr.bf16.mxu0 %v2777_v1  ;;  %3719 = vmatprep.mubr.msk.bf16.mxu1 %vm1763_vm0, %v2779_v2 }
 0x20a   :  { %v3830_v50 = vadd.f32 %v2225_v11, %v5691_v14  ;;  %v3862_v13 = vadd.f32 %v2677_v12, %v5693_v15  ;;  %v2227_v18 = vpop.f32.mrb[27].mxu0  ;;  %v2679_v19 = vpop.f32.mrb[27].mxu1  ;;  %3092 = vmatmul.mubr.bf16.gmra.mrb[52].mxu0 %v2776_v63  ;;  %3189 = vmatmul.mubr.bf16.gmra.mrb[52].mxu1 %v2778_v0  ;;  %v2740_v22 = vmax.f32 %v3828_v5, 0.0  ;;  %v2742_v23 = vmax.f32 %v3860_v6, 0.0 }
 0x20b   :  { %v3831_v20 = vadd.f32 %v2227_v18, %v5695_v16  ;;  %v3863_v21 = vadd.f32 %v2679_v19, %v5697_v17  ;;  %v2741_v26 = vmax.f32 %v3829_v9, 0.0  ;;  %v2743_v27 = vmax.f32 %v3861_v10, 0.0  ;;  %v5781_v9 = vld [vmem:[%s5855_s5] ss:$0 sm:$0xff] }
 0x20c   :  { %v2744_v24 = vmax.f32 %v3830_v50, 0.0  ;;  %v2746_v25 = vmax.f32 %v3862_v13, 0.0 }
 0x20d   :  { %v2745_v28 = vmax.f32 %v3831_v20, 0.0  ;;  %v2747_v29 = vmax.f32 %v3863_v21, 0.0 }
 0x20e   :  { %v2780_v30 = vpack.c.bf16 %v2744_v24, %v2740_v22  ;;  %v2782_v31 = vpack.c.bf16 %v2746_v25, %v2742_v23 }
 0x20f   :  { %v2781_v32 = vpack.c.bf16 %v2745_v28, %v2741_v26  ;;  %v2783_v33 = vpack.c.bf16 %v2747_v29, %v2743_v27  ;;  %v2231_v34 = vpop.f32.mrb[28].mxu0  ;;  %v2683_v35 = vpop.f32.mrb[28].mxu1 }
 0x210   :  { %v3832_v36 = vadd.f32 %v2231_v34, %v5691_v14  ;;  %v3864_v37 = vadd.f32 %v2683_v35, %v5693_v15  ;;  %v2233_v38 = vpop.f32.mrb[29].mxu0  ;;  %v2685_v39 = vpop.f32.mrb[29].mxu1 }
 0x211   :  { %v3833_v40 = vadd.f32 %v2233_v38, %v5695_v16  ;;  %v3865_v41 = vadd.f32 %v2685_v39, %v5697_v17  ;;  %v2235_v42 = vpop.f32.mrb[30].mxu0  ;;  %v2687_v43 = vpop.f32.mrb[30].mxu1  ;;  %3099 = vmatprep.mubr.bf16.mxu0 %v2781_v32  ;;  %3720 = vmatprep.mubr.msk.bf16.mxu1 %vm1763_vm0, %v2783_v33 }
 0x212   :  { %v3834_v44 = vadd.f32 %v2235_v42, %v5691_v14  ;;  %v3866_v45 = vadd.f32 %v2687_v43, %v5693_v15  ;;  %v2237_v46 = vpop.f32.mrb[31].mxu0  ;;  %v2689_v47 = vpop.f32.mrb[31].mxu1  ;;  %3100 = vmatmul.mubr.bf16.gmra.mrb[56].mxu0 %v2780_v30  ;;  %3197 = vmatmul.mubr.bf16.gmra.mrb[56].mxu1 %v2782_v31  ;;  %v2748_v51 = vmax.f32 %v3832_v36, 0.0  ;;  %v2750_v52 = vmax.f32 %v3864_v37, 0.0 }
 0x213   :  { %v3835_v48 = vadd.f32 %v2237_v46, %v5695_v16  ;;  %v3867_v49 = vadd.f32 %v2689_v47, %v5697_v17  ;;  %v2749_v55 = vmax.f32 %v3833_v40, 0.0  ;;  %v2751_v56 = vmax.f32 %v3865_v41, 0.0  ;;  %v5774_v17 = vld [vmem:[%s5854_s4] ss:$0 sm:$0xff] }
 0x214   :  { %v2752_v53 = vmax.f32 %v3834_v44, 0.0  ;;  %v2754_v54 = vmax.f32 %v3866_v45, 0.0 }
 0x215   :  { %v2753_v57 = vmax.f32 %v3835_v48, 0.0  ;;  %v2755_v58 = vmax.f32 %v3867_v49, 0.0 }
 0x216   :  { %v2784_v59 = vpack.c.bf16 %v2752_v53, %v2748_v51  ;;  %v2786_v14 = vpack.c.bf16 %v2754_v54, %v2750_v52 }
 0x217   :  { %v2785_v60 = vpack.c.bf16 %v2753_v57, %v2749_v55  ;;  %v2787_v15 = vpack.c.bf16 %v2755_v58, %v2751_v56 }
 0x219   :  { %3107 = vmatprep.mubr.bf16.mxu0 %v2785_v60  ;;  %3721 = vmatprep.mubr.msk.bf16.mxu1 %vm1763_vm0, %v2787_v15 }
 0x21a   :  { %3108 = vmatmul.mubr.bf16.gmra.mrb[60].mxu0 %v2784_v59  ;;  %3205 = vmatmul.mubr.bf16.gmra.mrb[60].mxu1 %v2786_v14 }
 0x2b5   :  { %v3756_v16 = vpop.f32.mrb[32].mxu0  ;;  %v3150_v61 = vpop.f32.mrb[32].mxu1 }
 0x2b6   :  { %v3757_v62 = vpop.f32.mrb[33].mxu0  ;;  %v3152_v63 = vpop.f32.mrb[33].mxu1 }
 0x2b7   :  { %v3758_v0 = vadd.f32 %v3757_v62, %v3756_v16  ;;  %v3759_v1 = vpop.f32.mrb[34].mxu0  ;;  %v3153_v2 = vpop.f32.mrb[34].mxu1 }
 0x2b8   :  { %v3760_v3 = vpop.f32.mrb[35].mxu0  ;;  %v3155_v4 = vpop.f32.mrb[35].mxu1 }
 0x2b9   :  { %v3054_v5 = vadd.f32 %v3758_v0, %v5774_v17  ;;  %v3761_v6 = vadd.f32 %v3760_v3, %v3759_v1 }
 0x2bb   :  { %v3057_v7 = vadd.f32 %v3761_v6, %v5774_v17  ;;  %v3151_v8 = vadd.f32 %v3150_v61, %v3054_v5 }
 0x2bd   :  { %v3154_v10 = vadd.f32 %v3153_v2, %v3057_v7  ;;  %v3762_v11 = vpop.f32.mrb[36].mxu0  ;;  %v3158_v12 = vpop.f32.mrb[36].mxu1  ;;  %v3213_v50 = vmax.f32 %v3151_v8, 0.0 }
 0x2be   :  { %v3763_v13 = vpop.f32.mrb[37].mxu0  ;;  %v3160_v18 = vpop.f32.mrb[37].mxu1 }
 0x2bf   :  { %v3764_v19 = vadd.f32 %v3763_v13, %v3762_v11  ;;  %v3765_v20 = vpop.f32.mrb[38].mxu0  ;;  %v3161_v21 = vpop.f32.mrb[38].mxu1  ;;  %v3236_v22 = vmul.f32 %v5781_v9, %v3213_v50  ;;  %v3214_v23 = vmax.f32 %v3154_v10, 0.0 }
 0x2c0   :  { %v3766_v24 = vpop.f32.mrb[39].mxu0  ;;  %v3163_v25 = vpop.f32.mrb[39].mxu1 }
 0x2c1   :  { %v3062_v26 = vadd.f32 %v3764_v19, %v5774_v17  ;;  %v3767_v27 = vadd.f32 %v3766_v24, %v3765_v20  ;;  %v3253_v28 = vsel %vm3252_vm1, %v3236_v22, 0.0  ;;  %v3237_v29 = vmul.f32 %v5781_v9, %v3214_v23 }
 0x2c2   :  { %3254 = vadd.xlane.f32.xlu0 %v3253_v28 }
 0x2c3   :  { %v3065_v30 = vadd.f32 %v3767_v27, %v5774_v17  ;;  %v3159_v31 = vadd.f32 %v3158_v12, %v3062_v26  ;;  %v3256_v35 = vsel %vm3252_vm1, %v3237_v29, 0.0 }
 0x2c5   :  { %v3162_v32 = vadd.f32 %v3161_v21, %v3065_v30  ;;  %v3768_v33 = vpop.f32.mrb[40].mxu0  ;;  %v3166_v34 = vpop.f32.mrb[40].mxu1  ;;  %v3215_v36 = vmax.f32 %v3159_v31, 0.0 }
 0x2c6   :  { %v3769_v37 = vpop.f32.mrb[41].mxu0  ;;  %v3168_v38 = vpop.f32.mrb[41].mxu1  ;;  %3257 = vadd.xlane.f32.xlu0 %v3256_v35 }
 0x2c7   :  { %v3770_v39 = vadd.f32 %v3769_v37, %v3768_v33  ;;  %v3771_v40 = vpop.f32.mrb[42].mxu0  ;;  %v3169_v41 = vpop.f32.mrb[42].mxu1  ;;  %v3238_v42 = vmul.f32 %v5781_v9, %v3215_v36  ;;  %v3216_v43 = vmax.f32 %v3162_v32, 0.0 }
 0x2c8   :  { %v3772_v44 = vpop.f32.mrb[43].mxu0  ;;  %v3171_v45 = vpop.f32.mrb[43].mxu1 }
 0x2c9   :  { %v3070_v46 = vadd.f32 %v3770_v39, %v5774_v17  ;;  %v3773_v47 = vadd.f32 %v3772_v44, %v3771_v40  ;;  %v3259_v48 = vsel %vm3252_vm1, %v3238_v42, 0.0  ;;  %v3239_v49 = vmul.f32 %v5781_v9, %v3216_v43 }
 0x2ca   :  { %3260 = vadd.xlane.f32.xlu1 %v3259_v48 }
 0x2cb   :  { %v3167_v51 = vadd.f32 %v3166_v34, %v3070_v46  ;;  %v3073_v52 = vadd.f32 %v3773_v47, %v5774_v17  ;;  %v3262_v56 = vsel %vm3252_vm1, %v3239_v49, 0.0 }
 0x2cd   :  { %v3170_v53 = vadd.f32 %v3169_v41, %v3073_v52  ;;  %v3774_v54 = vpop.f32.mrb[44].mxu0  ;;  %v3174_v55 = vpop.f32.mrb[44].mxu1  ;;  %v3217_v57 = vmax.f32 %v3167_v51, 0.0 }
 0x2ce   :  { %v3775_v58 = vpop.f32.mrb[45].mxu0  ;;  %v3176_v59 = vpop.f32.mrb[45].mxu1  ;;  %3263 = vadd.xlane.f32.xlu1 %v3262_v56 }
 0x2cf   :  { %v3776_v14 = vadd.f32 %v3775_v58, %v3774_v54  ;;  %v3777_v60 = vpop.f32.mrb[46].mxu0  ;;  %v3177_v15 = vpop.f32.mrb[46].mxu1  ;;  %v3240_v16 = vmul.f32 %v5781_v9, %v3217_v57  ;;  %v3218_v61 = vmax.f32 %v3170_v53, 0.0 }
 0x2d0   :  { %v3778_v62 = vpop.f32.mrb[47].mxu0  ;;  %v3179_v63 = vpop.f32.mrb[47].mxu1 }
 0x2d1   :  { %v3078_v0 = vadd.f32 %v3776_v14, %v5774_v17  ;;  %v3779_v1 = vadd.f32 %v3778_v62, %v3777_v60  ;;  %v3265_v2 = vsel %vm3252_vm1, %v3240_v16, 0.0  ;;  %v3241_v3 = vmul.f32 %v5781_v9, %v3218_v61 }
 0x2d2   :  { %3266 = vadd.xlane.f32.xlu0 %v3265_v2 }
 0x2d3   :  { %v3175_v4 = vadd.f32 %v3174_v55, %v3078_v0  ;;  %v3081_v5 = vadd.f32 %v3779_v1, %v5774_v17  ;;  %v3268_v6 = vsel %vm3252_vm1, %v3241_v3, 0.0 }
 0x2d4   :  { %3269 = vadd.xlane.f32.xlu1 %v3268_v6 }
 0x2d5   :  { %v3178_v7 = vadd.f32 %v3177_v15, %v3081_v5  ;;  %v3780_v8 = vpop.f32.mrb[48].mxu0  ;;  %v3182_v10 = vpop.f32.mrb[48].mxu1  ;;  %v3219_v11 = vmax.f32 %v3175_v4, 0.0 }
 0x2d6   :  { %v3781_v12 = vpop.f32.mrb[49].mxu0  ;;  %v3184_v50 = vpop.f32.mrb[49].mxu1 }
 0x2d7   :  { %v3782_v13 = vadd.f32 %v3781_v12, %v3780_v8  ;;  %v3783_v18 = vpop.f32.mrb[50].mxu0  ;;  %v3185_v19 = vpop.f32.mrb[50].mxu1  ;;  %v3242_v20 = vmul.f32 %v5781_v9, %v3219_v11  ;;  %v3220_v21 = vmax.f32 %v3178_v7, 0.0 }
 0x2d8   :  { %v3784_v22 = vpop.f32.mrb[51].mxu0  ;;  %v3187_v23 = vpop.f32.mrb[51].mxu1 }
 0x2d9   :  { %v3086_v24 = vadd.f32 %v3782_v13, %v5774_v17  ;;  %v3785_v25 = vadd.f32 %v3784_v22, %v3783_v18  ;;  %v3271_v26 = vsel %vm3252_vm1, %v3242_v20, 0.0  ;;  %v3243_v27 = vmul.f32 %v5781_v9, %v3220_v21 }
 0x2da   :  { %3272 = vadd.xlane.f32.xlu0 %v3271_v26 }
 0x2db   :  { %v3183_v28 = vadd.f32 %v3182_v10, %v3086_v24  ;;  %v3089_v29 = vadd.f32 %v3785_v25, %v5774_v17  ;;  %v3274_v30 = vsel %vm3252_vm1, %v3243_v27, 0.0 }
 0x2dc   :  { %3275 = vadd.xlane.f32.xlu1 %v3274_v30 }
 0x2dd   :  { %v3186_v31 = vadd.f32 %v3185_v19, %v3089_v29  ;;  %v3786_v32 = vpop.f32.mrb[52].mxu0  ;;  %v3190_v33 = vpop.f32.mrb[52].mxu1  ;;  %v3221_v34 = vmax.f32 %v3183_v28, 0.0 }
 0x2de   :  { %v3787_v35 = vpop.f32.mrb[53].mxu0  ;;  %v3192_v36 = vpop.f32.mrb[53].mxu1 }
 0x2df   :  { %v3788_v37 = vadd.f32 %v3787_v35, %v3786_v32  ;;  %v3789_v38 = vpop.f32.mrb[54].mxu0  ;;  %v3193_v39 = vpop.f32.mrb[54].mxu1  ;;  %v3244_v40 = vmul.f32 %v5781_v9, %v3221_v34  ;;  %v3222_v41 = vmax.f32 %v3186_v31, 0.0  ;;  %v5829_v36 = vld [vmem:[#allocation2] ss:$0 sm:$0xff] }
 0x2e0   :  { %v3790_v42 = vpop.f32.mrb[55].mxu0  ;;  %v3195_v43 = vpop.f32.mrb[55].mxu1 }
 0x2e1   :  { %v3094_v44 = vadd.f32 %v3788_v37, %v5774_v17  ;;  %v3791_v45 = vadd.f32 %v3790_v42, %v3789_v38  ;;  %v3277_v46 = vsel %vm3252_vm1, %v3244_v40, 0.0  ;;  %v3245_v47 = vmul.f32 %v5781_v9, %v3222_v41 }
 0x2e2   :  { %3278 = vadd.xlane.f32.xlu0 %v3277_v46 }
 0x2e3   :  { %v3191_v48 = vadd.f32 %v3190_v33, %v3094_v44  ;;  %v3097_v49 = vadd.f32 %v3791_v45, %v5774_v17  ;;  %v3280_v51 = vsel %vm3252_vm1, %v3245_v47, 0.0 }
 0x2e4   :  { %3281 = vadd.xlane.f32.xlu1 %v3280_v51 }
 0x2e5   :  { %v3194_v52 = vadd.f32 %v3193_v39, %v3097_v49  ;;  %v3792_v53 = vpop.f32.mrb[56].mxu0  ;;  %v3198_v54 = vpop.f32.mrb[56].mxu1  ;;  %v3223_v55 = vmax.f32 %v3191_v48, 0.0 }
 0x2e6   :  { %v3793_v56 = vpop.f32.mrb[57].mxu0  ;;  %v3200_v57 = vpop.f32.mrb[57].mxu1 }
 0x2e7   :  { %v3794_v58 = vadd.f32 %v3793_v56, %v3792_v53  ;;  %v3795_v59 = vpop.f32.mrb[58].mxu0  ;;  %v3201_v14 = vpop.f32.mrb[58].mxu1  ;;  %v3246_v60 = vmul.f32 %v5781_v9, %v3223_v55  ;;  %v3224_v15 = vmax.f32 %v3194_v52, 0.0 }
 0x2e8   :  { %v3796_v16 = vpop.f32.mrb[59].mxu0  ;;  %v3203_v61 = vpop.f32.mrb[59].mxu1 }
 0x2e9   :  { %v3102_v62 = vadd.f32 %v3794_v58, %v5774_v17  ;;  %v3797_v63 = vadd.f32 %v3796_v16, %v3795_v59  ;;  %v3283_v0 = vsel %vm3252_vm1, %v3246_v60, 0.0  ;;  %v3247_v1 = vmul.f32 %v5781_v9, %v3224_v15 }
 0x2ea   :  { %3284 = vadd.xlane.f32.xlu0 %v3283_v0 }
 0x2eb   :  { %v3199_v2 = vadd.f32 %v3198_v54, %v3102_v62  ;;  %v3105_v3 = vadd.f32 %v3797_v63, %v5774_v17  ;;  %v3286_v4 = vsel %vm3252_vm1, %v3247_v1, 0.0 }
 0x2ec   :  { %3287 = vadd.xlane.f32.xlu1 %v3286_v4 }
 0x2ed   :  { %v3202_v5 = vadd.f32 %v3201_v14, %v3105_v3  ;;  %v3798_v6 = vpop.f32.mrb[60].mxu0  ;;  %v3206_v7 = vpop.f32.mrb[60].mxu1  ;;  %v3225_v8 = vmax.f32 %v3199_v2, 0.0 }
 0x2ee   :  { %v3799_v10 = vpop.f32.mrb[61].mxu0  ;;  %v3208_v11 = vpop.f32.mrb[61].mxu1 }
 0x2ef   :  { %v3800_v12 = vadd.f32 %v3799_v10, %v3798_v6  ;;  %v3801_v50 = vpop.f32.mrb[62].mxu0  ;;  %v3209_v13 = vpop.f32.mrb[62].mxu1  ;;  %v3248_v18 = vmul.f32 %v5781_v9, %v3225_v8  ;;  %v3226_v19 = vmax.f32 %v3202_v5, 0.0 }
 0x2f0   :  { %v3802_v20 = vpop.f32.mrb[63].mxu0  ;;  %v3211_v21 = vpop.f32.mrb[63].mxu1 }
 0x2f1   :  { %v3110_v22 = vadd.f32 %v3800_v12, %v5774_v17  ;;  %v3803_v23 = vadd.f32 %v3802_v20, %v3801_v50  ;;  %v3289_v24 = vsel %vm3252_vm1, %v3248_v18, 0.0  ;;  %v3249_v25 = vmul.f32 %v5781_v9, %v3226_v19 }
 0x2f2   :  { %3290 = vadd.xlane.f32.xlu0 %v3289_v24 }
 0x2f3   :  { %v3207_v26 = vadd.f32 %v3206_v7, %v3110_v22  ;;  %v3113_v27 = vadd.f32 %v3803_v23, %v5774_v17  ;;  %v3292_v28 = vsel %vm3252_vm1, %v3249_v25, 0.0 }
 0x2f4   :  { %3293 = vadd.xlane.f32.xlu1 %v3292_v28 }
 0x2f5   :  { %v3210_v29 = vadd.f32 %v3209_v13, %v3113_v27  ;;  %v3227_v30 = vmax.f32 %v3207_v26, 0.0 }
 0x2f7   :  { %v3250_v31 = vmul.f32 %v5781_v9, %v3227_v30  ;;  %v3228_v32 = vmax.f32 %v3210_v29, 0.0 }
 0x2f9   :  { %v3295_v33 = vsel %vm3252_vm1, %v3250_v31, 0.0  ;;  %v3251_v34 = vmul.f32 %v5781_v9, %v3228_v32 }
 0x2fa   :  { %3296 = vadd.xlane.f32.xlu0 %v3295_v33 }
 0x2fb   :  { %v3298_v35 = vsel %vm3252_vm1, %v3251_v34, 0.0 }
 0x2fc   :  { %3299 = vadd.xlane.f32.xlu1 %v3298_v35 }
 0x34f   :  { %v3255_v37 = vpop.xlane.xlu0 %3254 }
 0x350   :  { %v3308_v17 = vadd.f32 %v5829_v36, %v3255_v37 }
 0x352   :  { %v3724_v38 = vmul.f32 -1.442695, %v3308_v17 }
 0x353   :  { %v3258_v39 = vpop.xlane.xlu0 %3257 }
 0x354   :  { %4540 = vpow2.f32 %v3724_v38  ;;  %v3309_v40 = vadd.f32 %v5829_v36, %v3258_v39 }
 0x356   :  { %v3725_v41 = vmul.f32 -1.442695, %v3309_v40 }
 0x357   :  { %v3261_v42 = vpop.xlane.xlu1 %3260 }
 0x358   :  { %4542 = vpow2.f32 %v3725_v41  ;;  %v3310_v43 = vadd.f32 %v5829_v36, %v3261_v42 }
 0x35a   :  { %v3726_v9 = vmul.f32 -1.442695, %v3310_v43 }
 0x35b   :  { %v3264_v44 = vpop.xlane.xlu1 %3263 }
 0x35c   :  { %4544 = vpow2.f32 %v3726_v9  ;;  %v3311_v45 = vadd.f32 %v5829_v36, %v3264_v44 }
 0x35e   :  { %v4541_v46 = vpop.eup %4540  ;;  %v3727_v47 = vmul.f32 -1.442695, %v3311_v45 }
 0x35f   :  { %v3372_v48 = vadd.f32 1.0, %v4541_v46  ;;  %v3267_v49 = vpop.xlane.xlu0 %3266 }
 0x360   :  { %4546 = vpow2.f32 %v3727_v47  ;;  %v3312_v51 = vadd.f32 %v5829_v36, %v3267_v49 }
 0x361   :  { %4548 = vrcp.f32 %v3372_v48  ;;  %v3270_v52 = vpop.xlane.xlu1 %3269 }
 0x362   :  { %v4543_v53 = vpop.eup %4542  ;;  %v3728_v54 = vmul.f32 -1.442695, %v3312_v51  ;;  %v3313_v55 = vadd.f32 %v5829_v36, %v3270_v52 }
 0x363   :  { %v3373_v56 = vadd.f32 1.0, %v4543_v53 }
 0x364   :  { %4550 = vpow2.f32 %v3728_v54  ;;  %v3729_v57 = vmul.f32 -1.442695, %v3313_v55 }
 0x365   :  { %4552 = vrcp.f32 %v3373_v56 }
 0x366   :  { %v4545_v58 = vpop.eup %4544  ;;  %4554 = vpow2.f32 %v3729_v57 }
 0x367   :  { %v3374_v59 = vadd.f32 1.0, %v4545_v58  ;;  %v3273_v14 = vpop.xlane.xlu0 %3272 }
 0x368   :  { %v3314_v60 = vadd.f32 %v5829_v36, %v3273_v14 }
 0x369   :  { %4556 = vrcp.f32 %v3374_v59  ;;  %v3276_v15 = vpop.xlane.xlu1 %3275 }
 0x36a   :  { %v4547_v16 = vpop.eup %4546  ;;  %v3730_v61 = vmul.f32 -1.442695, %v3314_v60  ;;  %v3315_v62 = vadd.f32 %v5829_v36, %v3276_v15 }
 0x36b   :  { %v4549_v63 = vpop.eup %4548  ;;  %v3375_v0 = vadd.f32 1.0, %v4547_v16 }
 0x36c   :  { %3421 = vst.msk [vmem:[#allocation3] sm:$0xff] %vm3420_vm2, %v4549_v63  ;;  %4558 = vpow2.f32 %v3730_v61  ;;  %v3731_v1 = vmul.f32 -1.442695, %v3315_v62 }
 0x36d   :  { %4560 = vrcp.f32 %v3375_v0 }
 0x36e   :  { %v4551_v2 = vpop.eup %4550  ;;  %4562 = vpow2.f32 %v3731_v1 }
 0x36f   :  { %v4553_v3 = vpop.eup %4552  ;;  %v3376_v4 = vadd.f32 1.0, %v4551_v2  ;;  %v3279_v5 = vpop.xlane.xlu0 %3278 }
 0x370   :  { %v4555_v6 = vpop.eup %4554  ;;  %v3316_v7 = vadd.f32 %v5829_v36, %v3279_v5 }
 0x371   :  { %4564 = vrcp.f32 %v3376_v4  ;;  %v3377_v8 = vadd.f32 1.0, %v4555_v6  ;;  %v3282_v10 = vpop.xlane.xlu1 %3281 }
 0x372   :  { %v3732_v11 = vmul.f32 -1.442695, %v3316_v7  ;;  %v3317_v12 = vadd.f32 %v5829_v36, %v3282_v10 }
 0x373   :  { %v4557_v50 = vpop.eup %4556  ;;  %v3454_v13 = vld [vmem:[#allocation3] sm:$0xf]  ;;  %4566 = vrcp.f32 %v3377_v8 }
 0x374   :  { %3455 = vst [vmem:[%s5857_s7] sm:$0xf] %v3454_v13  ;;  %4568 = vpow2.f32 %v3732_v11  ;;  %v3733_v18 = vmul.f32 -1.442695, %v3317_v12 }
 0x376   :  { %v4559_v19 = vpop.eup %4558  ;;  %4570 = vpow2.f32 %v3733_v18 }
 0x377   :  { %v4561_v20 = vpop.eup %4560  ;;  %v3378_v21 = vadd.f32 1.0, %v4559_v19  ;;  %v3285_v22 = vpop.xlane.xlu0 %3284 }
 0x378   :  { %v4563_v23 = vpop.eup %4562  ;;  %v3318_v24 = vadd.f32 %v5829_v36, %v3285_v22 }
 0x379   :  { %4572 = vrcp.f32 %v3378_v21  ;;  %v3379_v25 = vadd.f32 1.0, %v4563_v23  ;;  %v3288_v26 = vpop.xlane.xlu1 %3287 }
 0x37a   :  { %v3734_v27 = vmul.f32 -1.442695, %v3318_v24  ;;  %v3319_v28 = vadd.f32 %v5829_v36, %v3288_v26 }
 0x37b   :  { %v4565_v29 = vpop.eup %4564  ;;  %4574 = vrcp.f32 %v3379_v25 }
 0x37c   :  { %4576 = vpow2.f32 %v3734_v27  ;;  %v3735_v30 = vmul.f32 -1.442695, %v3319_v28 }
 0x37d   :  { %v4567_v31 = vpop.eup %4566 }
 0x37e   :  { %v4569_v32 = vpop.eup %4568  ;;  %4578 = vpow2.f32 %v3735_v30 }
 0x37f   :  { %v3380_v33 = vadd.f32 1.0, %v4569_v32  ;;  %v3291_v34 = vpop.xlane.xlu0 %3290 }
 0x380   :  { %v4571_v35 = vpop.eup %4570  ;;  %v3320_v37 = vadd.f32 %v5829_v36, %v3291_v34 }
 0x381   :  { %4580 = vrcp.f32 %v3380_v33  ;;  %v3381_v17 = vadd.f32 1.0, %v4571_v35  ;;  %v3294_v38 = vpop.xlane.xlu1 %3293 }
 0x382   :  { %v3736_v39 = vmul.f32 -1.442695, %v3320_v37  ;;  %v3321_v40 = vadd.f32 %v5829_v36, %v3294_v38 }
 0x383   :  { %v4573_v41 = vpop.eup %4572  ;;  %4582 = vrcp.f32 %v3381_v17 }
 0x384   :  { %4584 = vpow2.f32 %v3736_v39  ;;  %v3737_v42 = vmul.f32 -1.442695, %v3321_v40 }
 0x385   :  { %v4575_v43 = vpop.eup %4574 }
 0x386   :  { %v4577_v9 = vpop.eup %4576  ;;  %4586 = vpow2.f32 %v3737_v42 }
 0x387   :  { %v3382_v44 = vadd.f32 1.0, %v4577_v9  ;;  %v3297_v45 = vpop.xlane.xlu0 %3296 }
 0x388   :  { %v4579_v46 = vpop.eup %4578  ;;  %v3322_v47 = vadd.f32 %v5829_v36, %v3297_v45 }
 0x389   :  { %4588 = vrcp.f32 %v3382_v44  ;;  %v3383_v48 = vadd.f32 1.0, %v4579_v46  ;;  %v3300_v49 = vpop.xlane.xlu1 %3299 }
 0x38a   :  { %v3738_v51 = vmul.f32 -1.442695, %v3322_v47  ;;  %v3323_v52 = vadd.f32 %v5829_v36, %v3300_v49 }
 0x38b   :  { %v4581_v53 = vpop.eup %4580  ;;  %4590 = vrcp.f32 %v3383_v48 }
 0x38c   :  { %4592 = vpow2.f32 %v3738_v51  ;;  %v3739_v54 = vmul.f32 -1.442695, %v3323_v52 }
 0x38d   :  { %v4583_v55 = vpop.eup %4582 }
 0x38e   :  { %v4585_v56 = vpop.eup %4584  ;;  %4594 = vpow2.f32 %v3739_v54 }
 0x38f   :  { %v3384_v57 = vadd.f32 1.0, %v4585_v56 }
 0x390   :  { %v4587_v58 = vpop.eup %4586 }
 0x391   :  { %4596 = vrcp.f32 %v3384_v57  ;;  %v3385_v59 = vadd.f32 1.0, %v4587_v58 }
 0x393   :  { %v4589_v14 = vpop.eup %4588  ;;  %4598 = vrcp.f32 %v3385_v59 }
 0x395   :  { %v4591_v60 = vpop.eup %4590 }
 0x396   :  { %v4593_v15 = vpop.eup %4592 }
 0x397   :  { %v3386_v16 = vadd.f32 1.0, %v4593_v15 }
 0x398   :  { %v4595_v61 = vpop.eup %4594 }
 0x399   :  { %4600 = vrcp.f32 %v3386_v16  ;;  %v3387_v62 = vadd.f32 1.0, %v4595_v61 }
 0x39b   :  { %v4597_v36 = vpop.eup %4596  ;;  %4602 = vrcp.f32 %v3387_v62 }
 0x39d   :  { %v4599_v63 = vpop.eup %4598 }
 0x3a3   :  { %v4601_v0 = vpop.eup %4600 }
 0x3a5   :  { %v4603_v1 = vpop.eup %4602 }

</bundles_post_ra>
